<compile_context>
chip_gen: v7x
topology: tpu7x:2x2x1
jax: 0.10.0
libtpu: 0.0.40
codegen_flags: <defaults>
</compile_context>

<pallas_src>
import functools

import jax
import jax.numpy as jnp
from jax.experimental import pallas as pl
from jax.experimental.pallas import tpu as pltpu


# ---------------------------------------------------------------------------
# Kernel: the full layer stack for one batch element.
#   grid = (B, L, KT): b = batch ("parallel"), l = layer ("arbitrary"),
#                      kt = tile of the 4*D MLP hidden dim ("arbitrary").
# Scratch carries the activation across layers; attention + ln_2 run once per
# (b, l) at kt == 0; each kt accumulates one MLP hidden tile onto residual-1;
# the last kt of the last layer writes the output.
# ---------------------------------------------------------------------------
def transformer_kernel(x_ref, g1_ref, b1_ref, wqkv_ref, bqkv_ref, wo_ref, bo_ref,
                       g2_ref, b2_ref, wfc_ref, bfc_ref, wpr_ref, bpr_ref,
                       o_ref,
                       xcur_ref, xa_ref, h2_ref, q_scr, k_scr, v_scr,
                       *, n_head, tq, tk):
    l = pl.program_id(1)
    kt = pl.program_id(2)
    num_l = pl.num_programs(1)
    num_kt = pl.num_programs(2)

    def layernorm(v, g, b):        # f32 statistics, eps matches nn.LayerNorm
        mu = jnp.mean(v, axis=-1, keepdims=True)
        var = jnp.mean((v - mu) ** 2, axis=-1, keepdims=True)
        return (v - mu) * jax.lax.rsqrt(var + 1e-5) * g + b

    # ---- start of the layer stack for this batch element --------------------
    @pl.when(jnp.logical_and(l == 0, kt == 0))
    def _load_input():
        xcur_ref[...] = x_ref[0].astype(jnp.float32)

    # ---- attention branch + ln_2: once per (batch, layer) -------------------
    @pl.when(kt == 0)
    def _attention_and_ln2():
        x = xcur_ref[...]                                   # (S, D) f32
        S, D = x.shape
        hd = D // n_head

        h1 = layernorm(x, g1_ref[0], b1_ref[0]).astype(jnp.bfloat16)
        # softmax scale is pre-folded into the q columns of wqkv / bqkv
        qkv = jnp.dot(h1, wqkv_ref[0],
                      preferred_element_type=jnp.float32) + bqkv_ref[0]
        q_scr[...] = qkv[:, :D].astype(jnp.bfloat16)        # dense stores, no
        k_scr[...] = qkv[:, D:2 * D].astype(jnp.bfloat16)   # per-head repack
        v_scr[...] = qkv[:, 2 * D:].astype(jnp.bfloat16)

        bo = bo_ref[0]
        g2 = g2_ref[0]
        b2 = b2_ref[0]
        num_qt = S // tq
        num_kv = S // tk

        @pl.loop(0, num_qt)
        def _q_tile(qi):
            qrow = qi * tq
            if tq % 8 == 0:
                qrow = pl.multiple_of(qrow, 8)

            attn_t = jnp.zeros((tq, D), jnp.float32)
            for hh in range(n_head):                         # static unroll
                c0, c1 = hh * hd, (hh + 1) * hd
                q_h = q_scr[pl.ds(qrow, tq), c0:c1]          # (tq, hd) bf16

                def kv_step(ki, carry, _c0=c0, _c1=c1, _q_h=q_h):
                    m_i, l_i, acc = carry
                    krow = ki * tk
                    if tk % 8 == 0:
                        krow = pl.multiple_of(krow, 8)
                    k_h = k_scr[pl.ds(krow, tk), _c0:_c1]    # (tk, hd) bf16
                    v_h = v_scr[pl.ds(krow, tk), _c0:_c1]
                    s = jax.lax.dot_general(                 # (tq, tk) f32
                        _q_h, k_h, (((1,), (1,)), ((), ())),
                        preferred_element_type=jnp.float32)
                    m_new = jnp.maximum(m_i, s.max(axis=-1, keepdims=True))
                    alpha = jnp.exp(m_i - m_new)
                    p = jnp.exp(s - m_new)
                    l_new = alpha * l_i + p.sum(axis=-1, keepdims=True)
                    acc_new = alpha * acc + jnp.dot(
                        p.astype(jnp.bfloat16), v_h,
                        preferred_element_type=jnp.float32)  # (tq, hd)
                    return m_new, l_new, acc_new

                m0 = jnp.full((tq, 1), -jnp.inf, jnp.float32)
                l0 = jnp.zeros((tq, 1), jnp.float32)
                a0 = jnp.zeros((tq, hd), jnp.float32)
                _, l_f, a_f = jax.lax.fori_loop(0, num_kv, kv_step, (m0, l0, a0))
                o_h = a_f * pl.reciprocal(l_f, approx=True)  # (tq, hd) f32
                # per-head out-projection accumulation (no head concat)
                attn_t = attn_t + jnp.dot(
                    o_h.astype(jnp.bfloat16), wo_ref[0, c0:c1, :],
                    preferred_element_type=jnp.float32)      # (tq, D)

            attn_t = attn_t + bo
            xa_t = xcur_ref[pl.ds(qrow, tq), :] + attn_t     # residual 1
            xa_ref[pl.ds(qrow, tq), :] = xa_t
            h2_ref[pl.ds(qrow, tq), :] = layernorm(
                xa_t, g2, b2).astype(jnp.bfloat16)

    # ---- one MLP hidden tile, every grid step --------------------------------
    ff = jnp.dot(h2_ref[...], wfc_ref[0],
                 preferred_element_type=jnp.float32) + bfc_ref[0]   # (S, ft)
    ff = ff * jax.nn.sigmoid(1.702 * ff)                            # QuickGELU
    xa_ref[...] += jnp.dot(ff.astype(jnp.bfloat16), wpr_ref[0],
                           preferred_element_type=jnp.float32)      # (S, D)

    # ---- finish the layer: c_proj bias; result becomes next layer's input ----
    @pl.when(kt == num_kt - 1)
    def _finish_layer():
        xcur_ref[...] = xa_ref[...] + bpr_ref[0]

    @pl.when(jnp.logical_and(kt == num_kt - 1, l == num_l - 1))
    def _write_output():
        o_ref[0] = xcur_ref[...].astype(o_ref.dtype)


# ---------------------------------------------------------------------------
# Tile / VMEM defaults (generation-dependent)
# ---------------------------------------------------------------------------
def _pick_tile(n, target):
    if n <= target:
        return n
    best = 1
    for t in range(target, 0, -1):
        if n % t == 0:
            best = t
            break
    if best < max(8, target // 4):     # awkward (e.g. prime) sizes: no tiling
        return n
    return best


def _device_defaults(D, S):
    try:
        cap = int(pltpu.get_tpu_info().vmem_capacity_bytes)
    except Exception:
        cap = 64 * 1024 * 1024         # conservative (v7x-sized) fallback
    # leave headroom for compiler-internal scratch: ~48 MiB on v7x, ~96 on v5e/v6e
    vmem_limit = min(cap * 3 // 4, 112 * 1024 * 1024)
    big_vmem = cap >= 100 * 1024 * 1024
    ff_tile = _pick_tile(4 * D, 2048 if big_vmem else 512)
    tq = _pick_tile(S, 128)
    tk = _pick_tile(S, 256)            # multiple of 256 (v6e/v7x) / 128 (v5e)
    return ff_tile, tq, tk, vmem_limit


# ---------------------------------------------------------------------------
# Wrapper: whole layer stack as one pallas_call
# ---------------------------------------------------------------------------
def _transformer_stack_call(x_bsd, sp, n_head, *, ff_tile, tq, tk, vmem_limit):
    B, S, D = x_bsd.shape
    L = sp["wqkv"].shape[0]
    F = 4 * D
    num_kt = F // ff_tile
    hd = D // n_head
    assert D % n_head == 0

    kern = functools.partial(transformer_kernel, n_head=n_head, tq=tq, tk=tk)

    def lmap(nd):
        return lambda b, l, kt, _nd=nd: (l,) + (0,) * (_nd - 1)

    in_specs = [
        pl.BlockSpec((1, S, D), lambda b, l, kt: (b, 0, 0)),          # x
        pl.BlockSpec((1, 1, D), lmap(3)),                             # ln_1 gamma
        pl.BlockSpec((1, 1, D), lmap(3)),                             # ln_1 beta
        pl.BlockSpec((1, D, 3 * D), lmap(3)),                         # in-proj W
        pl.BlockSpec((1, 1, 3 * D), lmap(3)),                         # in-proj b
        pl.BlockSpec((1, D, D), lmap(3)),                             # out-proj W
        pl.BlockSpec((1, 1, D), lmap(3)),                             # out-proj b
        pl.BlockSpec((1, 1, D), lmap(3)),                             # ln_2 gamma
        pl.BlockSpec((1, 1, D), lmap(3)),                             # ln_2 beta
        pl.BlockSpec((1, D, ff_tile), lambda b, l, kt: (l, 0, kt)),   # c_fc W tile
        pl.BlockSpec((1, 1, ff_tile), lambda b, l, kt: (l, 0, kt)),   # c_fc b tile
        pl.BlockSpec((1, ff_tile, D), lambda b, l, kt: (l, kt, 0)),   # c_proj W tile
        pl.BlockSpec((1, 1, D), lmap(3)),                             # c_proj b
    ]

    return pl.pallas_call(
        kern,
        out_shape=jax.ShapeDtypeStruct((B, S, D), x_bsd.dtype),
        grid=(B, L, num_kt),
        in_specs=in_specs,
        out_specs=pl.BlockSpec((1, S, D), lambda b, l, kt: (b, 0, 0)),
        scratch_shapes=[
            pltpu.VMEM((S, D), jnp.float32),     # current activation (layer in)
            pltpu.VMEM((S, D), jnp.float32),     # residual-1 + MLP accumulator
            pltpu.VMEM((S, D), jnp.bfloat16),    # ln_2 activations (matmul dtype)
            pltpu.VMEM((S, D), jnp.bfloat16),    # q (pre-scaled)
            pltpu.VMEM((S, D), jnp.bfloat16),    # k
            pltpu.VMEM((S, D), jnp.bfloat16),    # v
        ],
        input_output_aliases={0: 0},             # write output in place over x
        compiler_params=pltpu.CompilerParams(
            dimension_semantics=("parallel", "arbitrary", "arbitrary"),
            vmem_limit_bytes=int(vmem_limit),
        ),
    )(x_bsd, sp["g1"], sp["b1"], sp["wqkv"], sp["bqkv"], sp["wo"], sp["bo"],
      sp["g2"], sp["b2"], sp["wfc"], sp["bfc"], sp["wpr"], sp["bpr"])


def _stack_and_fold_params(all_params, n_head):
    """Stack per-layer params with a leading layer dim; fold 1/sqrt(hd) into q."""
    D = all_params[0]["wo"].shape[0]
    hd = D // n_head
    scale = 1.0 / (hd ** 0.5)
    sp = {k: jnp.stack([p[k] for p in all_params]) for k in all_params[0]}
    wqkv = sp["wqkv"].astype(jnp.float32)
    wqkv = wqkv.at[:, :, :D].multiply(scale)
    sp["wqkv"] = wqkv.astype(all_params[0]["wqkv"].dtype)
    sp["bqkv"] = sp["bqkv"].at[:, :, :D].multiply(scale)
    return sp


def transformer_pallas(x_sbd, all_params, n_head):
    # x_sbd: (seq, batch, width) -- PyTorch MultiheadAttention layout
    x = jnp.transpose(x_sbd, (1, 0, 2))          # -> (B, S, D)
    B, S, D = x.shape
    sp = _stack_and_fold_params(all_params, n_head)
    ff_tile, tq, tk, vmem_limit = _device_defaults(D, S)
    y = _transformer_stack_call(x, sp, n_head, ff_tile=ff_tile, tq=tq, tk=tk,
                                vmem_limit=vmem_limit)
    return jnp.transpose(y, (1, 0, 2))           # back to (S, B, D)


# ---------------------------------------------------------------------------
# Deterministic parameter init (weights stored transposed: (in, out); matmul
# weights bf16, biases / LayerNorm params f32)
# ---------------------------------------------------------------------------
def init_params(key, width, layers):
    params = []
    D = width
    for l in range(layers):
        ks = jax.random.split(jax.random.fold_in(key, l), 8)
        p = {
            "g1": jnp.ones((1, D), jnp.float32),
            "b1": jnp.zeros((1, D), jnp.float32),
            "wqkv": (0.02 * jax.random.normal(ks[0], (D, 3 * D), jnp.float32)
                     ).astype(jnp.bfloat16),
            "bqkv": 0.02 * jax.random.normal(ks[1], (1, 3 * D), jnp.float32),
            "wo": (0.02 * jax.random.normal(ks[2], (D, D), jnp.float32)
                   ).astype(jnp.bfloat16),
            "bo": 0.02 * jax.random.normal(ks[3], (1, D), jnp.float32),
            "g2": jnp.ones((1, D), jnp.float32),
            "b2": jnp.zeros((1, D), jnp.float32),
            "wfc": (0.02 * jax.random.normal(ks[4], (D, 4 * D), jnp.float32)
                    ).astype(jnp.bfloat16),
            "bfc": 0.02 * jax.random.normal(ks[5], (1, 4 * D), jnp.float32),
            "wpr": (0.02 * jax.random.normal(ks[6], (4 * D, D), jnp.float32)
                    ).astype(jnp.bfloat16),
            "bpr": 0.02 * jax.random.normal(ks[7], (1, D), jnp.float32),
        }
        params.append(p)
    return params


# ---------------------------------------------------------------------------
# Pure-JAX f32 reference (same bf16 weights, cast up; f32 math throughout)
# ---------------------------------------------------------------------------
def transformer_ref(x_sbd, all_params, n_head):
    x = jnp.transpose(x_sbd, (1, 0, 2)).astype(jnp.float32)   # (B, S, D)
    B, S, D = x.shape
    hd = D // n_head

    def ln(v, g, b):
        mu = jnp.mean(v, -1, keepdims=True)
        var = jnp.mean((v - mu) ** 2, -1, keepdims=True)
        return (v - mu) * jax.lax.rsqrt(var + 1e-5) * g + b

    for p in all_params:
        h = ln(x, p["g1"][0], p["b1"][0])
        qkv = h @ p["wqkv"].astype(jnp.float32) + p["bqkv"][0]
        q, k, v = jnp.split(qkv, 3, axis=-1)
        q = q.reshape(B, S, n_head, hd).transpose(0, 2, 1, 3)
        k = k.reshape(B, S, n_head, hd).transpose(0, 2, 1, 3)
        v = v.reshape(B, S, n_head, hd).transpose(0, 2, 1, 3)
        s = jnp.einsum("bhqd,bhkd->bhqk", q, k) / (hd ** 0.5)
        pz = jax.nn.softmax(s, axis=-1)
        a = jnp.einsum("bhqk,bhkd->bhqd", pz, v).transpose(0, 2, 1, 3).reshape(B, S, D)
        a = a @ p["wo"].astype(jnp.float32) + p["bo"][0]
        x = x + a
        h2 = ln(x, p["g2"][0], p["b2"][0])
        ff = h2 @ p["wfc"].astype(jnp.float32) + p["bfc"][0]
        ff = ff * jax.nn.sigmoid(1.702 * ff)
        ff = ff @ p["wpr"].astype(jnp.float32) + p["bpr"][0]
        x = x + ff
    return jnp.transpose(x, (1, 0, 2))


if __name__ == "__main__":
    # Small shapes consistent with the module: Transformer(width=32, layers=2, heads=4)
    SEQ, BATCH, WIDTH, HEADS, LAYERS = 8, 2, 32, 4, 2

    key = jax.random.PRNGKey(0)
    kx, kp = jax.random.split(key)
    x = jax.random.normal(kx, (SEQ, BATCH, WIDTH), jnp.float32)   # (S, B, D)
    params = init_params(kp, WIDTH, LAYERS)

    fwd = jax.jit(functools.partial(transformer_pallas, n_head=HEADS))
    out = jax.block_until_ready(fwd(x, params))

    ref = transformer_ref(x, params, HEADS)
    assert out.shape == (SEQ, BATCH, WIDTH)
    # bf16 matmuls + approx reciprocal + folded scale vs f32 reference
    assert jnp.allclose(out, ref, atol=2e-2, rtol=2e-2), "mismatch vs reference"

    print("KERNEL_OK")
</pallas_src>

<mosaic_0001>
module attributes {stable_mosaic.version = 11 : i64} {
  func.func @transformer_kernel(%arg0: i32, %arg1: i32, %arg2: i32, %arg3: memref<1x8x32xf32, #tpu.memory_space<vmem>>, %arg4: memref<1x1x32xf32, #tpu.memory_space<vmem>>, %arg5: memref<1x1x32xf32, #tpu.memory_space<vmem>>, %arg6: memref<1x32x96xbf16, #tpu.memory_space<vmem>>, %arg7: memref<1x1x96xf32, #tpu.memory_space<vmem>>, %arg8: memref<1x32x32xbf16, #tpu.memory_space<vmem>>, %arg9: memref<1x1x32xf32, #tpu.memory_space<vmem>>, %arg10: memref<1x1x32xf32, #tpu.memory_space<vmem>>, %arg11: memref<1x1x32xf32, #tpu.memory_space<vmem>>, %arg12: memref<1x32x128xbf16, #tpu.memory_space<vmem>>, %arg13: memref<1x1x128xf32, #tpu.memory_space<vmem>>, %arg14: memref<1x128x32xbf16, #tpu.memory_space<vmem>>, %arg15: memref<1x1x32xf32, #tpu.memory_space<vmem>>, %arg16: memref<1x8x32xf32, #tpu.memory_space<vmem>>, %arg17: memref<8x32xf32, #tpu.memory_space<vmem>>, %arg18: memref<8x32xf32, #tpu.memory_space<vmem>>, %arg19: memref<8x32xbf16, #tpu.memory_space<vmem>>, %arg20: memref<8x32xbf16, #tpu.memory_space<vmem>>, %arg21: memref<8x32xbf16, #tpu.memory_space<vmem>>, %arg22: memref<8x32xbf16, #tpu.memory_space<vmem>>) attributes {dimension_semantics = [#tpu.dimension_semantics<parallel>, #tpu.dimension_semantics<arbitrary>, #tpu.dimension_semantics<arbitrary>], iteration_bounds = array<i64: 2, 2, 1>, scalar_prefetch = 0 : i64, scratch_operands = 6 : i64, tpu.core_type = #tpu.core_type<tc>, window_params = [{transform_indices = @transform_0, window_bounds = array<i64: 1, 8, 32>}, {transform_indices = @transform_1, window_bounds = array<i64: 1, 1, 32>}, {transform_indices = @transform_2, window_bounds = array<i64: 1, 1, 32>}, {transform_indices = @transform_3, window_bounds = array<i64: 1, 32, 96>}, {transform_indices = @transform_4, window_bounds = array<i64: 1, 1, 96>}, {transform_indices = @transform_5, window_bounds = array<i64: 1, 32, 32>}, {transform_indices = @transform_6, window_bounds = array<i64: 1, 1, 32>}, {transform_indices = @transform_7, window_bounds = array<i64: 1, 1, 32>}, {transform_indices = @transform_8, window_bounds = array<i64: 1, 1, 32>}, {transform_indices = @transform_9, window_bounds = array<i64: 1, 32, 128>}, {transform_indices = @transform_10, window_bounds = array<i64: 1, 1, 128>}, {transform_indices = @transform_11, window_bounds = array<i64: 1, 128, 32>}, {transform_indices = @transform_12, window_bounds = array<i64: 1, 1, 32>}, {transform_indices = @transform_13, window_bounds = array<i64: 1, 8, 32>}]} {
    %c0_i32 = arith.constant 0 : i32
    %0 = arith.cmpi eq, %arg1, %c0_i32 : i32
    %c0_i32_0 = arith.constant 0 : i32
    %1 = arith.cmpi eq, %arg2, %c0_i32_0 : i32
    %2 = arith.andi %0, %1 : i1
    %3 = arith.extui %2 : i1 to i32
    %c0_i32_1 = arith.constant 0 : i32
    %4 = arith.cmpi ne, %3, %c0_i32_1 : i32
    scf.if %4 {
      %c0_25 = arith.constant 0 : index
      %c0_26 = arith.constant 0 : index
      %c0_27 = arith.constant 0 : index
      %39 = vector.load %arg3[%c0_25, %c0_26, %c0_27] : memref<1x8x32xf32, #tpu.memory_space<vmem>>, vector<1x8x32xf32>
      %40 = vector.shape_cast %39 : vector<1x8x32xf32> to vector<8x32xf32>
      %c0_28 = arith.constant 0 : index
      %c0_29 = arith.constant 0 : index
      %41 = vector.load %arg17[%c0_28, %c0_29] : memref<8x32xf32, #tpu.memory_space<vmem>>, vector<8x32xf32>
      tpu.vector_store %arg17[%c0_28, %c0_29], %40 {strides = array<i32>} : memref<8x32xf32, #tpu.memory_space<vmem>>, vector<8x32xf32>,
    } else {
    }
    %c0_i32_2 = arith.constant 0 : i32
    %5 = arith.cmpi eq, %arg2, %c0_i32_2 : i32
    %6 = arith.extui %5 : i1 to i32
    %c0_i32_3 = arith.constant 0 : i32
    %7 = arith.cmpi ne, %6, %c0_i32_3 : i32
    scf.if %7 {
      %c0_25 = arith.constant 0 : index
      %c0_26 = arith.constant 0 : index
      %39 = vector.load %arg17[%c0_25, %c0_26] : memref<8x32xf32, #tpu.memory_space<vmem>>, vector<8x32xf32>
      %c0_27 = arith.constant 0 : index
      %c0_28 = arith.constant 0 : index
      %c0_29 = arith.constant 0 : index
      %40 = vector.load %arg4[%c0_27, %c0_28, %c0_29] : memref<1x1x32xf32, #tpu.memory_space<vmem>>, vector<1x1x32xf32>
      %41 = vector.shape_cast %40 : vector<1x1x32xf32> to vector<1x32xf32>
      %c0_30 = arith.constant 0 : index
      %c0_31 = arith.constant 0 : index
      %c0_32 = arith.constant 0 : index
      %42 = vector.load %arg5[%c0_30, %c0_31, %c0_32] : memref<1x1x32xf32, #tpu.memory_space<vmem>>, vector<1x1x32xf32>
      %43 = vector.shape_cast %42 : vector<1x1x32xf32> to vector<1x32xf32>
      %cst_33 = arith.constant dense<0.000000e+00> : vector<8xf32>
      %44 = vector.multi_reduction <add>, %39, %cst_33 [1] : vector<8x32xf32> to vector<8xf32>
      %45 = vector.shape_cast %44 : vector<8xf32> to vector<8x1xf32>
      %cst_34 = arith.constant 3.200000e+01 : f32
      %46 = vector.broadcast %cst_34 : f32 to vector<8x1xf32>
      %47 = arith.divf %45, %46 : vector<8x1xf32>
      %48 = vector.broadcast %47 : vector<8x1xf32> to vector<8x32xf32>
      %49 = arith.subf %39, %48 : vector<8x32xf32>
      %50 = arith.mulf %49, %49 : vector<8x32xf32>
      %cst_35 = arith.constant dense<0.000000e+00> : vector<8xf32>
      %51 = vector.multi_reduction <add>, %50, %cst_35 [1] : vector<8x32xf32> to vector<8xf32>
      %52 = vector.shape_cast %51 : vector<8xf32> to vector<8x1xf32>
      %cst_36 = arith.constant 3.200000e+01 : f32
      %53 = vector.broadcast %cst_36 : f32 to vector<8x1xf32>
      %54 = arith.divf %52, %53 : vector<8x1xf32>
      %55 = vector.broadcast %47 : vector<8x1xf32> to vector<8x32xf32>
      %56 = arith.subf %39, %55 : vector<8x32xf32>
      %cst_37 = arith.constant 9.99999974E-6 : f32
      %57 = vector.broadcast %cst_37 : f32 to vector<8x1xf32>
      %58 = arith.addf %54, %57 : vector<8x1xf32>
      %59 = math.rsqrt %58 : vector<8x1xf32>
      %60 = vector.broadcast %59 : vector<8x1xf32> to vector<8x32xf32>
      %61 = arith.mulf %56, %60 : vector<8x32xf32>
      %62 = vector.broadcast %41 : vector<1x32xf32> to vector<8x32xf32>
      %63 = arith.mulf %61, %62 : vector<8x32xf32>
      %64 = vector.broadcast %43 : vector<1x32xf32> to vector<8x32xf32>
      %65 = arith.addf %63, %64 : vector<8x32xf32>
      %66 = arith.truncf %65 : vector<8x32xf32> to vector<8x32xbf16>
      %c0_38 = arith.constant 0 : index
      %c0_39 = arith.constant 0 : index
      %c0_40 = arith.constant 0 : index
      %67 = vector.load %arg6[%c0_38, %c0_39, %c0_40] : memref<1x32x96xbf16, #tpu.memory_space<vmem>>, vector<1x32x96xbf16>
      %68 = vector.shape_cast %67 : vector<1x32x96xbf16> to vector<32x96xbf16>
      %cst_41 = arith.constant dense<0.000000e+00> : vector<8x96xf32>
      %69 = tpu.matmul %66, %68, %cst_41 {dimension_numbers = #tpu.dot_dimension_numbers<[1], [0], [0], [1], [0, 0, 1, 1], [], []>} : vector<8x32xbf16>, vector<32x96xbf16>, vector<8x96xf32> -> vector<8x96xf32>
      %c0_42 = arith.constant 0 : index
      %c0_43 = arith.constant 0 : index
      %c0_44 = arith.constant 0 : index
      %70 = vector.load %arg7[%c0_42, %c0_43, %c0_44] : memref<1x1x96xf32, #tpu.memory_space<vmem>>, vector<1x1x96xf32>
      %71 = vector.shape_cast %70 : vector<1x1x96xf32> to vector<1x96xf32>
      %72 = vector.broadcast %71 : vector<1x96xf32> to vector<8x96xf32>
      %73 = arith.addf %69, %72 : vector<8x96xf32>
      %74 = vector.extract_strided_slice %73 {offsets = [0, 0], sizes = [8, 32], strides = [1, 1]} : vector<8x96xf32> to vector<8x32xf32>
      %75 = arith.truncf %74 : vector<8x32xf32> to vector<8x32xbf16>
      %c0_45 = arith.constant 0 : index
      %c0_46 = arith.constant 0 : index
      %76 = vector.load %arg20[%c0_45, %c0_46] : memref<8x32xbf16, #tpu.memory_space<vmem>>, vector<8x32xbf16>
      tpu.vector_store %arg20[%c0_45, %c0_46], %75 {strides = array<i32>} : memref<8x32xbf16, #tpu.memory_space<vmem>>, vector<8x32xbf16>,
      %77 = vector.extract_strided_slice %73 {offsets = [0, 32], sizes = [8, 32], strides = [1, 1]} : vector<8x96xf32> to vector<8x32xf32>
      %78 = arith.truncf %77 : vector<8x32xf32> to vector<8x32xbf16>
      %c0_47 = arith.constant 0 : index
      %c0_48 = arith.constant 0 : index
      %79 = vector.load %arg21[%c0_47, %c0_48] : memref<8x32xbf16, #tpu.memory_space<vmem>>, vector<8x32xbf16>
      tpu.vector_store %arg21[%c0_47, %c0_48], %78 {strides = array<i32>} : memref<8x32xbf16, #tpu.memory_space<vmem>>, vector<8x32xbf16>,
      %80 = vector.extract_strided_slice %73 {offsets = [0, 64], sizes = [8, 32], strides = [1, 1]} : vector<8x96xf32> to vector<8x32xf32>
      %81 = arith.truncf %80 : vector<8x32xf32> to vector<8x32xbf16>
      %c0_49 = arith.constant 0 : index
      %c0_50 = arith.constant 0 : index
      %82 = vector.load %arg22[%c0_49, %c0_50] : memref<8x32xbf16, #tpu.memory_space<vmem>>, vector<8x32xbf16>
      tpu.vector_store %arg22[%c0_49, %c0_50], %81 {strides = array<i32>} : memref<8x32xbf16, #tpu.memory_space<vmem>>, vector<8x32xbf16>,
      %c0_51 = arith.constant 0 : index
      %c0_52 = arith.constant 0 : index
      %c0_53 = arith.constant 0 : index
      %83 = vector.load %arg9[%c0_51, %c0_52, %c0_53] : memref<1x1x32xf32, #tpu.memory_space<vmem>>, vector<1x1x32xf32>
      %84 = vector.shape_cast %83 : vector<1x1x32xf32> to vector<1x32xf32>
      %c0_54 = arith.constant 0 : index
      %c0_55 = arith.constant 0 : index
      %c0_56 = arith.constant 0 : index
      %85 = vector.load %arg10[%c0_54, %c0_55, %c0_56] : memref<1x1x32xf32, #tpu.memory_space<vmem>>, vector<1x1x32xf32>
      %86 = vector.shape_cast %85 : vector<1x1x32xf32> to vector<1x32xf32>
      %c0_57 = arith.constant 0 : index
      %c0_58 = arith.constant 0 : index
      %c0_59 = arith.constant 0 : index
      %87 = vector.load %arg11[%c0_57, %c0_58, %c0_59] : memref<1x1x32xf32, #tpu.memory_space<vmem>>, vector<1x1x32xf32>
      %88 = vector.shape_cast %87 : vector<1x1x32xf32> to vector<1x32xf32>
      %c0_i32_60 = arith.constant 0 : i32
      %c1_i32_61 = arith.constant 1 : i32
      %89 = arith.muli %c0_i32_60, %c1_i32_61 : i32
      %c0_i32_62 = arith.constant 0 : i32
      %90 = arith.addi %c0_i32_62, %89 : i32
      %c8_i32 = arith.constant 8 : i32
      %91 = arith.muli %90, %c8_i32 : i32
      %92 = tpu.assume_multiple %91, 8 : i32
      %cst_63 = arith.constant 0.000000e+00 : f32
      %93 = vector.broadcast %cst_63 : f32 to vector<8x32xf32>
      %94 = arith.index_cast %92 : i32 to index
      %c0_64 = arith.constant 0 : index
      %95 = vector.load %arg20[%94, %c0_64] : memref<8x32xbf16, #tpu.memory_space<vmem>>, vector<8x8xbf16>
      %cst_65 = arith.constant 0xFF800000 : f32
      %96 = vector.broadcast %cst_65 : f32 to vector<8x1xf32>
      %cst_66 = arith.constant 0.000000e+00 : f32
      %97 = vector.broadcast %cst_66 : f32 to vector<8x1xf32>
      %cst_67 = arith.constant 0.000000e+00 : f32
      %98 = vector.broadcast %cst_67 : f32 to vector<8x8xf32>
      %c0_i32_68 = arith.constant 0 : i32
      %c8_i32_69 = arith.constant 8 : i32
      %99 = arith.muli %c0_i32_68, %c8_i32_69 : i32
      %100 = tpu.assume_multiple %99, 8 : i32
      %101 = arith.index_cast %100 : i32 to index
      %c0_70 = arith.constant 0 : index
      %102 = vector.load %arg21[%101, %c0_70] : memref<8x32xbf16, #tpu.memory_space<vmem>>, vector<8x8xbf16>
      %103 = arith.index_cast %100 : i32 to index
      %c0_71 = arith.constant 0 : index
      %104 = vector.load %arg22[%103, %c0_71] : memref<8x32xbf16, #tpu.memory_space<vmem>>, vector<8x8xbf16>
      %cst_72 = arith.constant dense<0.000000e+00> : vector<8x8xf32>
      %105 = tpu.matmul %95, %102, %cst_72 {dimension_numbers = #tpu.dot_dimension_numbers<[1], [1], [0], [0], [0, 0, 1, 0], [], []>} : vector<8x8xbf16>, vector<8x8xbf16>, vector<8x8xf32> -> vector<8x8xf32>
      %cst_73 = arith.constant dense<0xFF800000> : vector<8xf32>
      %106 = vector.multi_reduction <maximumf>, %105, %cst_73 [1] : vector<8x8xf32> to vector<8xf32>
      %107 = vector.shape_cast %106 : vector<8xf32> to vector<8x1xf32>
      %108 = arith.maximumf %96, %107 : vector<8x1xf32>
      %109 = arith.subf %96, %108 : vector<8x1xf32>
      %110 = math.exp %109 : vector<8x1xf32>
      %111 = vector.broadcast %108 : vector<8x1xf32> to vector<8x8xf32>
      %112 = arith.subf %105, %111 : vector<8x8xf32>
      %113 = math.exp %112 : vector<8x8xf32>
      %114 = arith.mulf %110, %97 : vector<8x1xf32>
      %cst_74 = arith.constant dense<0.000000e+00> : vector<8xf32>
      %115 = vector.multi_reduction <add>, %113, %cst_74 [1] : vector<8x8xf32> to vector<8xf32>
      %116 = vector.shape_cast %115 : vector<8xf32> to vector<8x1xf32>
      %117 = arith.addf %114, %116 : vector<8x1xf32>
      %118 = vector.broadcast %110 : vector<8x1xf32> to vector<8x8xf32>
      %119 = arith.mulf %118, %98 : vector<8x8xf32>
      %120 = arith.truncf %113 : vector<8x8xf32> to vector<8x8xbf16>
      %cst_75 = arith.constant dense<0.000000e+00> : vector<8x8xf32>
      %121 = tpu.matmul %120, %104, %cst_75 {dimension_numbers = #tpu.dot_dimension_numbers<[1], [0], [0], [1], [0, 0, 1, 1], [], []>} : vector<8x8xbf16>, vector<8x8xbf16>, vector<8x8xf32> -> vector<8x8xf32>
      %122 = arith.addf %119, %121 : vector<8x8xf32>
      %c1_i32_76 = arith.constant 1 : i32
      %123 = tpu.reciprocal %117 {approx = true} : vector<8x1xf32> -> vector<8x1xf32>
      %124 = vector.broadcast %123 : vector<8x1xf32> to vector<8x8xf32>
      %125 = arith.mulf %122, %124 : vector<8x8xf32>
      %126 = arith.truncf %125 : vector<8x8xf32> to vector<8x8xbf16>
      %c0_77 = arith.constant 0 : index
      %c0_78 = arith.constant 0 : index
      %c0_79 = arith.constant 0 : index
      %127 = vector.load %arg8[%c0_77, %c0_78, %c0_79] : memref<1x32x32xbf16, #tpu.memory_space<vmem>>, vector<1x8x32xbf16>
      %128 = vector.shape_cast %127 : vector<1x8x32xbf16> to vector<8x32xbf16>
      %cst_80 = arith.constant dense<0.000000e+00> : vector<8x32xf32>
      %129 = tpu.matmul %126, %128, %cst_80 {dimension_numbers = #tpu.dot_dimension_numbers<[1], [0], [0], [1], [0, 0, 1, 1], [], []>} : vector<8x8xbf16>, vector<8x32xbf16>, vector<8x32xf32> -> vector<8x32xf32>
      %130 = arith.addf %93, %129 : vector<8x32xf32>
      %131 = arith.index_cast %92 : i32 to index
      %c8 = arith.constant 8 : index
      %132 = vector.load %arg20[%131, %c8] : memref<8x32xbf16, #tpu.memory_space<vmem>>, vector<8x8xbf16>
      %cst_81 = arith.constant 0xFF800000 : f32
      %133 = vector.broadcast %cst_81 : f32 to vector<8x1xf32>
      %cst_82 = arith.constant 0.000000e+00 : f32
      %134 = vector.broadcast %cst_82 : f32 to vector<8x1xf32>
      %cst_83 = arith.constant 0.000000e+00 : f32
      %135 = vector.broadcast %cst_83 : f32 to vector<8x8xf32>
      %c0_i32_84 = arith.constant 0 : i32
      %c8_i32_85 = arith.constant 8 : i32
      %136 = arith.muli %c0_i32_84, %c8_i32_85 : i32
      %137 = tpu.assume_multiple %136, 8 : i32
      %138 = arith.index_cast %137 : i32 to index
      %c8_86 = arith.constant 8 : index
      %139 = vector.load %arg21[%138, %c8_86] : memref<8x32xbf16, #tpu.memory_space<vmem>>, vector<8x8xbf16>
      %140 = arith.index_cast %137 : i32 to index
      %c8_87 = arith.constant 8 : index
      %141 = vector.load %arg22[%140, %c8_87] : memref<8x32xbf16, #tpu.memory_space<vmem>>, vector<8x8xbf16>
      %cst_88 = arith.constant dense<0.000000e+00> : vector<8x8xf32>
      %142 = tpu.matmul %132, %139, %cst_88 {dimension_numbers = #tpu.dot_dimension_numbers<[1], [1], [0], [0], [0, 0, 1, 0], [], []>} : vector<8x8xbf16>, vector<8x8xbf16>, vector<8x8xf32> -> vector<8x8xf32>
      %cst_89 = arith.constant dense<0xFF800000> : vector<8xf32>
      %143 = vector.multi_reduction <maximumf>, %142, %cst_89 [1] : vector<8x8xf32> to vector<8xf32>
      %144 = vector.shape_cast %143 : vector<8xf32> to vector<8x1xf32>
      %145 = arith.maximumf %133, %144 : vector<8x1xf32>
      %146 = arith.subf %133, %145 : vector<8x1xf32>
      %147 = math.exp %146 : vector<8x1xf32>
      %148 = vector.broadcast %145 : vector<8x1xf32> to vector<8x8xf32>
      %149 = arith.subf %142, %148 : vector<8x8xf32>
      %150 = math.exp %149 : vector<8x8xf32>
      %151 = arith.mulf %147, %134 : vector<8x1xf32>
      %cst_90 = arith.constant dense<0.000000e+00> : vector<8xf32>
      %152 = vector.multi_reduction <add>, %150, %cst_90 [1] : vector<8x8xf32> to vector<8xf32>
      %153 = vector.shape_cast %152 : vector<8xf32> to vector<8x1xf32>
      %154 = arith.addf %151, %153 : vector<8x1xf32>
      %155 = vector.broadcast %147 : vector<8x1xf32> to vector<8x8xf32>
      %156 = arith.mulf %155, %135 : vector<8x8xf32>
      %157 = arith.truncf %150 : vector<8x8xf32> to vector<8x8xbf16>
      %cst_91 = arith.constant dense<0.000000e+00> : vector<8x8xf32>
      %158 = tpu.matmul %157, %141, %cst_91 {dimension_numbers = #tpu.dot_dimension_numbers<[1], [0], [0], [1], [0, 0, 1, 1], [], []>} : vector<8x8xbf16>, vector<8x8xbf16>, vector<8x8xf32> -> vector<8x8xf32>
      %159 = arith.addf %156, %158 : vector<8x8xf32>
      %c1_i32_92 = arith.constant 1 : i32
      %160 = tpu.reciprocal %154 {approx = true} : vector<8x1xf32> -> vector<8x1xf32>
      %161 = vector.broadcast %160 : vector<8x1xf32> to vector<8x8xf32>
      %162 = arith.mulf %159, %161 : vector<8x8xf32>
      %163 = arith.truncf %162 : vector<8x8xf32> to vector<8x8xbf16>
      %c0_93 = arith.constant 0 : index
      %c8_94 = arith.constant 8 : index
      %c0_95 = arith.constant 0 : index
      %164 = vector.load %arg8[%c0_93, %c8_94, %c0_95] : memref<1x32x32xbf16, #tpu.memory_space<vmem>>, vector<1x8x32xbf16>
      %165 = vector.shape_cast %164 : vector<1x8x32xbf16> to vector<8x32xbf16>
      %cst_96 = arith.constant dense<0.000000e+00> : vector<8x32xf32>
      %166 = tpu.matmul %163, %165, %cst_96 {dimension_numbers = #tpu.dot_dimension_numbers<[1], [0], [0], [1], [0, 0, 1, 1], [], []>} : vector<8x8xbf16>, vector<8x32xbf16>, vector<8x32xf32> -> vector<8x32xf32>
      %167 = arith.addf %130, %166 : vector<8x32xf32>
      %168 = arith.index_cast %92 : i32 to index
      %c16 = arith.constant 16 : index
      %169 = vector.load %arg20[%168, %c16] : memref<8x32xbf16, #tpu.memory_space<vmem>>, vector<8x8xbf16>
      %cst_97 = arith.constant 0xFF800000 : f32
      %170 = vector.broadcast %cst_97 : f32 to vector<8x1xf32>
      %cst_98 = arith.constant 0.000000e+00 : f32
      %171 = vector.broadcast %cst_98 : f32 to vector<8x1xf32>
      %cst_99 = arith.constant 0.000000e+00 : f32
      %172 = vector.broadcast %cst_99 : f32 to vector<8x8xf32>
      %c0_i32_100 = arith.constant 0 : i32
      %c8_i32_101 = arith.constant 8 : i32
      %173 = arith.muli %c0_i32_100, %c8_i32_101 : i32
      %174 = tpu.assume_multiple %173, 8 : i32
      %175 = arith.index_cast %174 : i32 to index
      %c16_102 = arith.constant 16 : index
      %176 = vector.load %arg21[%175, %c16_102] : memref<8x32xbf16, #tpu.memory_space<vmem>>, vector<8x8xbf16>
      %177 = arith.index_cast %174 : i32 to index
      %c16_103 = arith.constant 16 : index
      %178 = vector.load %arg22[%177, %c16_103] : memref<8x32xbf16, #tpu.memory_space<vmem>>, vector<8x8xbf16>
      %cst_104 = arith.constant dense<0.000000e+00> : vector<8x8xf32>
      %179 = tpu.matmul %169, %176, %cst_104 {dimension_numbers = #tpu.dot_dimension_numbers<[1], [1], [0], [0], [0, 0, 1, 0], [], []>} : vector<8x8xbf16>, vector<8x8xbf16>, vector<8x8xf32> -> vector<8x8xf32>
      %cst_105 = arith.constant dense<0xFF800000> : vector<8xf32>
      %180 = vector.multi_reduction <maximumf>, %179, %cst_105 [1] : vector<8x8xf32> to vector<8xf32>
      %181 = vector.shape_cast %180 : vector<8xf32> to vector<8x1xf32>
      %182 = arith.maximumf %170, %181 : vector<8x1xf32>
      %183 = arith.subf %170, %182 : vector<8x1xf32>
      %184 = math.exp %183 : vector<8x1xf32>
      %185 = vector.broadcast %182 : vector<8x1xf32> to vector<8x8xf32>
      %186 = arith.subf %179, %185 : vector<8x8xf32>
      %187 = math.exp %186 : vector<8x8xf32>
      %188 = arith.mulf %184, %171 : vector<8x1xf32>
      %cst_106 = arith.constant dense<0.000000e+00> : vector<8xf32>
      %189 = vector.multi_reduction <add>, %187, %cst_106 [1] : vector<8x8xf32> to vector<8xf32>
      %190 = vector.shape_cast %189 : vector<8xf32> to vector<8x1xf32>
      %191 = arith.addf %188, %190 : vector<8x1xf32>
      %192 = vector.broadcast %184 : vector<8x1xf32> to vector<8x8xf32>
      %193 = arith.mulf %192, %172 : vector<8x8xf32>
      %194 = arith.truncf %187 : vector<8x8xf32> to vector<8x8xbf16>
      %cst_107 = arith.constant dense<0.000000e+00> : vector<8x8xf32>
      %195 = tpu.matmul %194, %178, %cst_107 {dimension_numbers = #tpu.dot_dimension_numbers<[1], [0], [0], [1], [0, 0, 1, 1], [], []>} : vector<8x8xbf16>, vector<8x8xbf16>, vector<8x8xf32> -> vector<8x8xf32>
      %196 = arith.addf %193, %195 : vector<8x8xf32>
      %c1_i32_108 = arith.constant 1 : i32
      %197 = tpu.reciprocal %191 {approx = true} : vector<8x1xf32> -> vector<8x1xf32>
      %198 = vector.broadcast %197 : vector<8x1xf32> to vector<8x8xf32>
      %199 = arith.mulf %196, %198 : vector<8x8xf32>
      %200 = arith.truncf %199 : vector<8x8xf32> to vector<8x8xbf16>
      %c0_109 = arith.constant 0 : index
      %c16_110 = arith.constant 16 : index
      %c0_111 = arith.constant 0 : index
      %201 = vector.load %arg8[%c0_109, %c16_110, %c0_111] : memref<1x32x32xbf16, #tpu.memory_space<vmem>>, vector<1x8x32xbf16>
      %202 = vector.shape_cast %201 : vector<1x8x32xbf16> to vector<8x32xbf16>
      %cst_112 = arith.constant dense<0.000000e+00> : vector<8x32xf32>
      %203 = tpu.matmul %200, %202, %cst_112 {dimension_numbers = #tpu.dot_dimension_numbers<[1], [0], [0], [1], [0, 0, 1, 1], [], []>} : vector<8x8xbf16>, vector<8x32xbf16>, vector<8x32xf32> -> vector<8x32xf32>
      %204 = arith.addf %167, %203 : vector<8x32xf32>
      %205 = arith.index_cast %92 : i32 to index
      %c24 = arith.constant 24 : index
      %206 = vector.load %arg20[%205, %c24] : memref<8x32xbf16, #tpu.memory_space<vmem>>, vector<8x8xbf16>
      %cst_113 = arith.constant 0xFF800000 : f32
      %207 = vector.broadcast %cst_113 : f32 to vector<8x1xf32>
      %cst_114 = arith.constant 0.000000e+00 : f32
      %208 = vector.broadcast %cst_114 : f32 to vector<8x1xf32>
      %cst_115 = arith.constant 0.000000e+00 : f32
      %209 = vector.broadcast %cst_115 : f32 to vector<8x8xf32>
      %c0_i32_116 = arith.constant 0 : i32
      %c8_i32_117 = arith.constant 8 : i32
      %210 = arith.muli %c0_i32_116, %c8_i32_117 : i32
      %211 = tpu.assume_multiple %210, 8 : i32
      %212 = arith.index_cast %211 : i32 to index
      %c24_118 = arith.constant 24 : index
      %213 = vector.load %arg21[%212, %c24_118] : memref<8x32xbf16, #tpu.memory_space<vmem>>, vector<8x8xbf16>
      %214 = arith.index_cast %211 : i32 to index
      %c24_119 = arith.constant 24 : index
      %215 = vector.load %arg22[%214, %c24_119] : memref<8x32xbf16, #tpu.memory_space<vmem>>, vector<8x8xbf16>
      %cst_120 = arith.constant dense<0.000000e+00> : vector<8x8xf32>
      %216 = tpu.matmul %206, %213, %cst_120 {dimension_numbers = #tpu.dot_dimension_numbers<[1], [1], [0], [0], [0, 0, 1, 0], [], []>} : vector<8x8xbf16>, vector<8x8xbf16>, vector<8x8xf32> -> vector<8x8xf32>
      %cst_121 = arith.constant dense<0xFF800000> : vector<8xf32>
      %217 = vector.multi_reduction <maximumf>, %216, %cst_121 [1] : vector<8x8xf32> to vector<8xf32>
      %218 = vector.shape_cast %217 : vector<8xf32> to vector<8x1xf32>
      %219 = arith.maximumf %207, %218 : vector<8x1xf32>
      %220 = arith.subf %207, %219 : vector<8x1xf32>
      %221 = math.exp %220 : vector<8x1xf32>
      %222 = vector.broadcast %219 : vector<8x1xf32> to vector<8x8xf32>
      %223 = arith.subf %216, %222 : vector<8x8xf32>
      %224 = math.exp %223 : vector<8x8xf32>
      %225 = arith.mulf %221, %208 : vector<8x1xf32>
      %cst_122 = arith.constant dense<0.000000e+00> : vector<8xf32>
      %226 = vector.multi_reduction <add>, %224, %cst_122 [1] : vector<8x8xf32> to vector<8xf32>
      %227 = vector.shape_cast %226 : vector<8xf32> to vector<8x1xf32>
      %228 = arith.addf %225, %227 : vector<8x1xf32>
      %229 = vector.broadcast %221 : vector<8x1xf32> to vector<8x8xf32>
      %230 = arith.mulf %229, %209 : vector<8x8xf32>
      %231 = arith.truncf %224 : vector<8x8xf32> to vector<8x8xbf16>
      %cst_123 = arith.constant dense<0.000000e+00> : vector<8x8xf32>
      %232 = tpu.matmul %231, %215, %cst_123 {dimension_numbers = #tpu.dot_dimension_numbers<[1], [0], [0], [1], [0, 0, 1, 1], [], []>} : vector<8x8xbf16>, vector<8x8xbf16>, vector<8x8xf32> -> vector<8x8xf32>
      %233 = arith.addf %230, %232 : vector<8x8xf32>
      %c1_i32_124 = arith.constant 1 : i32
      %234 = tpu.reciprocal %228 {approx = true} : vector<8x1xf32> -> vector<8x1xf32>
      %235 = vector.broadcast %234 : vector<8x1xf32> to vector<8x8xf32>
      %236 = arith.mulf %233, %235 : vector<8x8xf32>
      %237 = arith.truncf %236 : vector<8x8xf32> to vector<8x8xbf16>
      %c0_125 = arith.constant 0 : index
      %c24_126 = arith.constant 24 : index
      %c0_127 = arith.constant 0 : index
      %238 = vector.load %arg8[%c0_125, %c24_126, %c0_127] : memref<1x32x32xbf16, #tpu.memory_space<vmem>>, vector<1x8x32xbf16>
      %239 = vector.shape_cast %238 : vector<1x8x32xbf16> to vector<8x32xbf16>
      %cst_128 = arith.constant dense<0.000000e+00> : vector<8x32xf32>
      %240 = tpu.matmul %237, %239, %cst_128 {dimension_numbers = #tpu.dot_dimension_numbers<[1], [0], [0], [1], [0, 0, 1, 1], [], []>} : vector<8x8xbf16>, vector<8x32xbf16>, vector<8x32xf32> -> vector<8x32xf32>
      %241 = arith.addf %204, %240 : vector<8x32xf32>
      %242 = vector.broadcast %84 : vector<1x32xf32> to vector<8x32xf32>
      %243 = arith.addf %241, %242 : vector<8x32xf32>
      %244 = arith.index_cast %92 : i32 to index
      %c0_129 = arith.constant 0 : index
      %245 = vector.load %arg17[%244, %c0_129] : memref<8x32xf32, #tpu.memory_space<vmem>>, vector<8x32xf32>
      %246 = arith.addf %245, %243 : vector<8x32xf32>
      %247 = arith.index_cast %92 : i32 to index
      %c0_130 = arith.constant 0 : index
      %248 = vector.load %arg18[%247, %c0_130] : memref<8x32xf32, #tpu.memory_space<vmem>>, vector<8x32xf32>
      tpu.vector_store %arg18[%247, %c0_130], %246 {strides = array<i32>} : memref<8x32xf32, #tpu.memory_space<vmem>>, vector<8x32xf32>,
      %cst_131 = arith.constant dense<0.000000e+00> : vector<8xf32>
      %249 = vector.multi_reduction <add>, %246, %cst_131 [1] : vector<8x32xf32> to vector<8xf32>
      %250 = vector.shape_cast %249 : vector<8xf32> to vector<8x1xf32>
      %cst_132 = arith.constant 3.200000e+01 : f32
      %251 = vector.broadcast %cst_132 : f32 to vector<8x1xf32>
      %252 = arith.divf %250, %251 : vector<8x1xf32>
      %253 = vector.broadcast %252 : vector<8x1xf32> to vector<8x32xf32>
      %254 = arith.subf %246, %253 : vector<8x32xf32>
      %255 = arith.mulf %254, %254 : vector<8x32xf32>
      %cst_133 = arith.constant dense<0.000000e+00> : vector<8xf32>
      %256 = vector.multi_reduction <add>, %255, %cst_133 [1] : vector<8x32xf32> to vector<8xf32>
      %257 = vector.shape_cast %256 : vector<8xf32> to vector<8x1xf32>
      %cst_134 = arith.constant 3.200000e+01 : f32
      %258 = vector.broadcast %cst_134 : f32 to vector<8x1xf32>
      %259 = arith.divf %257, %258 : vector<8x1xf32>
      %260 = vector.broadcast %252 : vector<8x1xf32> to vector<8x32xf32>
      %261 = arith.subf %246, %260 : vector<8x32xf32>
      %cst_135 = arith.constant 9.99999974E-6 : f32
      %262 = vector.broadcast %cst_135 : f32 to vector<8x1xf32>
      %263 = arith.addf %259, %262 : vector<8x1xf32>
      %264 = math.rsqrt %263 : vector<8x1xf32>
      %265 = vector.broadcast %264 : vector<8x1xf32> to vector<8x32xf32>
      %266 = arith.mulf %261, %265 : vector<8x32xf32>
      %267 = vector.broadcast %86 : vector<1x32xf32> to vector<8x32xf32>
      %268 = arith.mulf %266, %267 : vector<8x32xf32>
      %269 = vector.broadcast %88 : vector<1x32xf32> to vector<8x32xf32>
      %270 = arith.addf %268, %269 : vector<8x32xf32>
      %271 = arith.truncf %270 : vector<8x32xf32> to vector<8x32xbf16>
      %272 = arith.index_cast %92 : i32 to index
      %c0_136 = arith.constant 0 : index
      %273 = vector.load %arg19[%272, %c0_136] : memref<8x32xbf16, #tpu.memory_space<vmem>>, vector<8x32xbf16>
      tpu.vector_store %arg19[%272, %c0_136], %271 {strides = array<i32>} : memref<8x32xbf16, #tpu.memory_space<vmem>>, vector<8x32xbf16>,
      %c1_i32_137 = arith.constant 1 : i32
    } else {
    }
    %c0 = arith.constant 0 : index
    %c0_4 = arith.constant 0 : index
    %8 = vector.load %arg19[%c0, %c0_4] : memref<8x32xbf16, #tpu.memory_space<vmem>>, vector<8x32xbf16>
    %c0_5 = arith.constant 0 : index
    %c0_6 = arith.constant 0 : index
    %c0_7 = arith.constant 0 : index
    %9 = vector.load %arg12[%c0_5, %c0_6, %c0_7] : memref<1x32x128xbf16, #tpu.memory_space<vmem>>, vector<1x32x128xbf16>
    %10 = vector.shape_cast %9 : vector<1x32x128xbf16> to vector<32x128xbf16>
    %cst = arith.constant dense<0.000000e+00> : vector<8x128xf32>
    %11 = tpu.matmul %8, %10, %cst {dimension_numbers = #tpu.dot_dimension_numbers<[1], [0], [0], [1], [0, 0, 1, 1], [], []>} : vector<8x32xbf16>, vector<32x128xbf16>, vector<8x128xf32> -> vector<8x128xf32>
    %c0_8 = arith.constant 0 : index
    %c0_9 = arith.constant 0 : index
    %c0_10 = arith.constant 0 : index
    %12 = vector.load %arg13[%c0_8, %c0_9, %c0_10] : memref<1x1x128xf32, #tpu.memory_space<vmem>>, vector<1x1x128xf32>
    %13 = vector.shape_cast %12 : vector<1x1x128xf32> to vector<1x128xf32>
    %14 = vector.broadcast %13 : vector<1x128xf32> to vector<8x128xf32>
    %15 = arith.addf %11, %14 : vector<8x128xf32>
    %cst_11 = arith.constant 1.702000e+00 : f32
    %16 = vector.broadcast %cst_11 : f32 to vector<8x128xf32>
    %17 = arith.mulf %16, %15 : vector<8x128xf32>
    %18 = arith.negf %17 : vector<8x128xf32>
    %19 = math.exp %18 : vector<8x128xf32>
    %cst_12 = arith.constant 1.000000e+00 : f32
    %20 = vector.broadcast %cst_12 : f32 to vector<8x128xf32>
    %21 = arith.addf %20, %19 : vector<8x128xf32>
    %22 = arith.divf %20, %21 : vector<8x128xf32>
    %23 = arith.mulf %15, %22 : vector<8x128xf32>
    %c0_13 = arith.constant 0 : index
    %c0_14 = arith.constant 0 : index
    %24 = vector.load %arg18[%c0_13, %c0_14] : memref<8x32xf32, #tpu.memory_space<vmem>>, vector<8x32xf32>
    %25 = arith.truncf %23 : vector<8x128xf32> to vector<8x128xbf16>
    %c0_15 = arith.constant 0 : index
    %c0_16 = arith.constant 0 : index
    %c0_17 = arith.constant 0 : index
    %26 = vector.load %arg14[%c0_15, %c0_16, %c0_17] : memref<1x128x32xbf16, #tpu.memory_space<vmem>>, vector<1x128x32xbf16>
    %27 = vector.shape_cast %26 : vector<1x128x32xbf16> to vector<128x32xbf16>
    %cst_18 = arith.constant dense<0.000000e+00> : vector<8x32xf32>
    %28 = tpu.matmul %25, %27, %cst_18 {dimension_numbers = #tpu.dot_dimension_numbers<[1], [0], [0], [1], [0, 0, 1, 1], [], []>} : vector<8x128xbf16>, vector<128x32xbf16>, vector<8x32xf32> -> vector<8x32xf32>
    %29 = arith.addf %24, %28 : vector<8x32xf32>
    %c0_19 = arith.constant 0 : index
    %c0_20 = arith.constant 0 : index
    %30 = vector.load %arg18[%c0_19, %c0_20] : memref<8x32xf32, #tpu.memory_space<vmem>>, vector<8x32xf32>
    tpu.vector_store %arg18[%c0_19, %c0_20], %29 {strides = array<i32>} : memref<8x32xf32, #tpu.memory_space<vmem>>, vector<8x32xf32>,
    %c0_i32_21 = arith.constant 0 : i32
    %31 = arith.cmpi eq, %arg2, %c0_i32_21 : i32
    %32 = arith.extui %31 : i1 to i32
    %c0_i32_22 = arith.constant 0 : i32
    %33 = arith.cmpi ne, %32, %c0_i32_22 : i32
    scf.if %33 {
      %c0_25 = arith.constant 0 : index
      %c0_26 = arith.constant 0 : index
      %39 = vector.load %arg18[%c0_25, %c0_26] : memref<8x32xf32, #tpu.memory_space<vmem>>, vector<8x32xf32>
      %c0_27 = arith.constant 0 : index
      %c0_28 = arith.constant 0 : index
      %c0_29 = arith.constant 0 : index
      %40 = vector.load %arg15[%c0_27, %c0_28, %c0_29] : memref<1x1x32xf32, #tpu.memory_space<vmem>>, vector<1x1x32xf32>
      %41 = vector.shape_cast %40 : vector<1x1x32xf32> to vector<1x32xf32>
      %42 = vector.broadcast %41 : vector<1x32xf32> to vector<8x32xf32>
      %43 = arith.addf %39, %42 : vector<8x32xf32>
      %c0_30 = arith.constant 0 : index
      %c0_31 = arith.constant 0 : index
      %44 = vector.load %arg17[%c0_30, %c0_31] : memref<8x32xf32, #tpu.memory_space<vmem>>, vector<8x32xf32>
      tpu.vector_store %arg17[%c0_30, %c0_31], %43 {strides = array<i32>} : memref<8x32xf32, #tpu.memory_space<vmem>>, vector<8x32xf32>,
    } else {
    }
    %c0_i32_23 = arith.constant 0 : i32
    %34 = arith.cmpi eq, %arg2, %c0_i32_23 : i32
    %c1_i32 = arith.constant 1 : i32
    %35 = arith.cmpi eq, %arg1, %c1_i32 : i32
    %36 = arith.andi %34, %35 : i1
    %37 = arith.extui %36 : i1 to i32
    %c0_i32_24 = arith.constant 0 : i32
    %38 = arith.cmpi ne, %37, %c0_i32_24 : i32
    scf.if %38 {
      %c0_25 = arith.constant 0 : index
      %c0_26 = arith.constant 0 : index
      %39 = vector.load %arg17[%c0_25, %c0_26] : memref<8x32xf32, #tpu.memory_space<vmem>>, vector<8x32xf32>
      %c0_27 = arith.constant 0 : index
      %c0_28 = arith.constant 0 : index
      %c0_29 = arith.constant 0 : index
      %40 = vector.load %arg16[%c0_27, %c0_28, %c0_29] : memref<1x8x32xf32, #tpu.memory_space<vmem>>, vector<1x8x32xf32>
      %41 = vector.shape_cast %40 : vector<1x8x32xf32> to vector<8x32xf32>
      %42 = vector.shape_cast %39 : vector<8x32xf32> to vector<1x8x32xf32>
      tpu.vector_store %arg16[%c0_27, %c0_28, %c0_29], %42 {strides = array<i32>} : memref<1x8x32xf32, #tpu.memory_space<vmem>>, vector<1x8x32xf32>,
    } else {
    }
    return
  }
  func.func @transform_0(%arg0: i32, %arg1: i32, %arg2: i32) -> (i32, i32, i32) {
    %c0_i32 = arith.constant 0 : i32
    %c0_i32_0 = arith.constant 0 : i32
    %c0_i32_1 = arith.constant 0 : i32
    return %arg0, %c0_i32, %c0_i32_0 : i32, i32, i32
  }
  func.func @transform_1(%arg0: i32, %arg1: i32, %arg2: i32) -> (i32, i32, i32) {
    %c0_i32 = arith.constant 0 : i32
    %c0_i32_0 = arith.constant 0 : i32
    %c0_i32_1 = arith.constant 0 : i32
    return %arg1, %c0_i32, %c0_i32_0 : i32, i32, i32
  }
  func.func @transform_2(%arg0: i32, %arg1: i32, %arg2: i32) -> (i32, i32, i32) {
    %c0_i32 = arith.constant 0 : i32
    %c0_i32_0 = arith.constant 0 : i32
    %c0_i32_1 = arith.constant 0 : i32
    return %arg1, %c0_i32, %c0_i32_0 : i32, i32, i32
  }
  func.func @transform_3(%arg0: i32, %arg1: i32, %arg2: i32) -> (i32, i32, i32) {
    %c0_i32 = arith.constant 0 : i32
    %c0_i32_0 = arith.constant 0 : i32
    %c0_i32_1 = arith.constant 0 : i32
    return %arg1, %c0_i32, %c0_i32_0 : i32, i32, i32
  }
  func.func @transform_4(%arg0: i32, %arg1: i32, %arg2: i32) -> (i32, i32, i32) {
    %c0_i32 = arith.constant 0 : i32
    %c0_i32_0 = arith.constant 0 : i32
    %c0_i32_1 = arith.constant 0 : i32
    return %arg1, %c0_i32, %c0_i32_0 : i32, i32, i32
  }
  func.func @transform_5(%arg0: i32, %arg1: i32, %arg2: i32) -> (i32, i32, i32) {
    %c0_i32 = arith.constant 0 : i32
    %c0_i32_0 = arith.constant 0 : i32
    %c0_i32_1 = arith.constant 0 : i32
    return %arg1, %c0_i32, %c0_i32_0 : i32, i32, i32
  }
  func.func @transform_6(%arg0: i32, %arg1: i32, %arg2: i32) -> (i32, i32, i32) {
    %c0_i32 = arith.constant 0 : i32
    %c0_i32_0 = arith.constant 0 : i32
    %c0_i32_1 = arith.constant 0 : i32
    return %arg1, %c0_i32, %c0_i32_0 : i32, i32, i32
  }
  func.func @transform_7(%arg0: i32, %arg1: i32, %arg2: i32) -> (i32, i32, i32) {
    %c0_i32 = arith.constant 0 : i32
    %c0_i32_0 = arith.constant 0 : i32
    %c0_i32_1 = arith.constant 0 : i32
    return %arg1, %c0_i32, %c0_i32_0 : i32, i32, i32
  }
  func.func @transform_8(%arg0: i32, %arg1: i32, %arg2: i32) -> (i32, i32, i32) {
    %c0_i32 = arith.constant 0 : i32
    %c0_i32_0 = arith.constant 0 : i32
    %c0_i32_1 = arith.constant 0 : i32
    return %arg1, %c0_i32, %c0_i32_0 : i32, i32, i32
  }
  func.func @transform_9(%arg0: i32, %arg1: i32, %arg2: i32) -> (i32, i32, i32) {
    %c0_i32 = arith.constant 0 : i32
    %c0_i32_0 = arith.constant 0 : i32
    return %arg1, %c0_i32, %arg2 : i32, i32, i32
  }
  func.func @transform_10(%arg0: i32, %arg1: i32, %arg2: i32) -> (i32, i32, i32) {
    %c0_i32 = arith.constant 0 : i32
    %c0_i32_0 = arith.constant 0 : i32
    return %arg1, %c0_i32, %arg2 : i32, i32, i32
  }
  func.func @transform_11(%arg0: i32, %arg1: i32, %arg2: i32) -> (i32, i32, i32) {
    %c0_i32 = arith.constant 0 : i32
    %c0_i32_0 = arith.constant 0 : i32
    return %arg1, %arg2, %c0_i32 : i32, i32, i32
  }
  func.func @transform_12(%arg0: i32, %arg1: i32, %arg2: i32) -> (i32, i32, i32) {
    %c0_i32 = arith.constant 0 : i32
    %c0_i32_0 = arith.constant 0 : i32
    %c0_i32_1 = arith.constant 0 : i32
    return %arg1, %c0_i32, %c0_i32_0 : i32, i32, i32
  }
  func.func @transform_13(%arg0: i32, %arg1: i32, %arg2: i32) -> (i32, i32, i32) {
    %c0_i32 = arith.constant 0 : i32
    %c0_i32_0 = arith.constant 0 : i32
    %c0_i32_1 = arith.constant 0 : i32
    return %arg0, %c0_i32, %c0_i32_0 : i32, i32, i32
  }
}

</mosaic_0001>

<bundles_post_ra>
// kernel: transformer_pallas.1
= control target key start
LH: loop header
LB: loop body
LE: loop exit
PB: predicated region body
PF: predicated region fallthrough
CT: control target
= control target key end

     0   :  { %s2348_s25 = smov 0   ;;  %s2350_s26 = smov 0   ;;  %s2648_s0 = inlined_call_operand.vmem [shape: f32[2,8,32], index: 0, kind: input, shape index: {}, may-alias: {0,13}]   ;;  %s2649_s1 = inlined_call_operand.vmem [shape: f32[2,1,32], index: 1, kind: input, shape index: {}]   ;;  %s2650_s2 = inlined_call_operand.vmem [shape: f32[2,1,32], index: 2, kind: input, shape index: {}]   ;;  %s2651_s3 = inlined_call_operand.vmem [shape: bf16[2,32,96], index: 3, kind: input, shape index: {}]   ;;  %s2652_s4 = inlined_call_operand.vmem [shape: f32[2,1,96], index: 4, kind: input, shape index: {}]   ;;  %s2653_s5 = inlined_call_operand.vmem [shape: bf16[2,32,32], index: 5, kind: input, shape index: {}]   ;;  %s2654_s6 = inlined_call_operand.vmem [shape: f32[2,1,32], index: 6, kind: input, shape index: {}]   ;;  %s2655_s7 = inlined_call_operand.vmem [shape: f32[2,1,32], index: 7, kind: input, shape index: {}]   ;;  %s2656_s8 = inlined_call_operand.vmem [shape: f32[2,1,32], index: 8, kind: input, shape index: {}]   ;;  %s2657_s9 = inlined_call_operand.vmem [shape: bf16[2,32,128], index: 9, kind: input, shape index: {}]   ;;  %s2658_s10 = inlined_call_operand.vmem [shape: f32[2,1,128], index: 10, kind: input, shape index: {}]   ;;  %s2659_s11 = inlined_call_operand.vmem [shape: bf16[2,128,32], index: 11, kind: input, shape index: {}]   ;;  %s2660_s12 = inlined_call_operand.vmem [shape: f32[2,1,32], index: 12, kind: input, shape index: {}]   ;;  %s2661_s13 = inlined_call_operand.vmem [shape: f32[2,8,32], index: 13, kind: output, shape index: {}, may-alias: {0,13}]  }
   0x1   :  { %2666 = sst [smem:[#allocation14_spill]] %s2648_s0  ;;  %s2352_s27 = smov 0  }
   0x2   :  { %2667 = sst [smem:[#allocation15_spill]] %s2650_s2  ;;  %s2354_s28 = smov 0  }
   0x3   :  { %2668 = sst [smem:[#allocation16_spill]] %s2651_s3  ;;  %s2356_s29 = smov 0  }
   0x4   :  { %2669 = sst [smem:[#allocation17_spill]] %s2653_s5 }
   0x5   :  { %2670 = sst [smem:[#allocation18_spill]] %s2661_s13 }
   0x6 LB: > { %2671 = sst [smem:[#allocation8_spill]] %s2253_s25  ;;  %s38_s30 = sadd.s32 1, %s2261_s27  ;;  %s2269_s29 = sphi %s2356_s29, %s23_s29   ;;  %s2265_s28 = sphi %s2354_s28, %s2695_s28   ;;  %s2261_s27 = sphi %s2352_s27, %s2694_s27   ;;  %s2257_s26 = sphi %s2350_s26, %s2693_s26   ;;  %s2253_s25 = sphi %s2348_s25, %s2692_s25  }
   0x7   : > { %2672 = sst [smem:[#allocation9_spill]] %s2261_s27  ;;  %s42_s14 = sadd.s32 1, %s2265_s28 }
   0x8   : > { %2673 = sst [smem:[#allocation10_spill]] %s2265_s28  ;;  %p40_p0 = scmp.ge.s32.totalorder %s38_s30, 2 }
   0x9   : > { %2674 = sst [smem:[#allocation11_spill]] %s2269_s29  ;;  %p1929_p1 = scmp.ge.s32.totalorder %s2269_s29, 1 }
   0xa   : > { %p526_p2 = scmp.lt.s32.totalorder %s2269_s29, 5  ;;  %s2697_s30 = smov (%p40_p0, %s38_s30), 0 }
   0xb   : > { %2675 = sst [smem:[#allocation12_spill]] %s2697_s30  ;;  %s2699_s14 = smov (!%p40_p0, %s42_s14), %s2265_s28 }
   0xc   : > { %p527_p3 = pnand %p1929_p1, %p526_p2  ;;  %p44_p4 = scmp.ge.s32.totalorder %s2699_s14, 2 }
   0xd   : > { %p622_p5 = scmp.lt.s32.totalorder (!%p527_p3), %s2257_s26, 1  ;;  %p626_p6 = scmp.lt.s32.totalorder (!%p527_p3), %s2253_s25, 1 }
   0xe   : > { %s2701_s14 = smov (%p44_p4, %s2699_s14), 0  ;;  %530 = sbr.rel (%p527_p3) target bundleno = 3667 (0xe53), region = 72 }
   0xf   : > { %2676 = sst [smem:[#allocation13_spill]] %s2701_s14  ;;  %p686_p7 = scmp.eq.s32.totalorder (!%p527_p3), %s2253_s25, 0 }
  0x10   : > { %s2677_s0 = sld [smem:[#allocation14_spill]] (!%p527_p3)  ;;  %s2679_s3 = sld [smem:[#allocation16_spill]] (!%p527_p3) }
  0x11   : > { %s2680_s5 = sld [smem:[#allocation17_spill]] (!%p527_p3) }
  0x15   : > { %s2703_s26 = smov (!%p622_p5, %s2257_s26), 1  ;;  %vm693_vm0 = vcmask (%p686_p7), 261120  }
  0x16   : > { %s2383_s15 = scalar_select %p626_p6, %s2253_s25, 1 }
  0x17   : > { %s1930_s16 = sshll.u32 %s2703_s26, 3 }
  0x18   : > { %s625_s19 = scalar_lea.vmem %s2677_s0, %s1930_s16  ;;  %s1983_s30 = sshll.u32 %s2383_s15, 4 }
  0x19   : > { %s2400_s29 = scalar_lea.vmem %s2679_s3, %s1983_s30  ;;  %s2409_s0 = scalar_lea.vmem %s2680_s5, %s1983_s30  ;;  %v692_v0 = vld [vmem:[%s625_s19] sm:$0xff] (%p686_p7) }
  0x1a   : > { %s2426_s26 = scalar_lea.vmem %s2657_s9, %s1983_s30  ;;  %s667_s13 = scalar_lea.vmem %s2658_s10, %s2383_s15  ;;  %694 = vst.msk [vmem:[#allocation2] sm:$0xff] (%p686_p7), %vm693_vm0, %v692_v0 }
  0x1b   : > { %s1986_s5 = sshll.u32 %s2383_s15, 6  ;;  %s680_s23 = scalar_lea.vmem %s2660_s12, %s2383_s15 }
  0x1c   : > { %s2440_s22 = scalar_lea.vmem %s2659_s11, %s1986_s5  ;;  %s2681_s3 = sld [smem:[#allocation18_spill]] }
  0x1d   : > { %691 = sbr.rel (!%p686_p7) target bundleno = 36 (0x24), region = 76 }
  0x22   : > { %s2445_s2 = scalar_lea.vmem %s2681_s3, %s1930_s16 }
  0x24 PF: > { %v2449_v1 = vld [vmem:[#allocation2] sm:$0xff]  ;;  %vm701_vm1 = vcmask 261120   ;;  %v2271_v9 = vmov 0.0   ;;  %vm2272_vm2 = vmmov 0   ;;  %v2185_v10 = vld [vmem:[%s2400_s29 + $0x8] sm:$0xff]   ;;  %s2684_s25 = sld [smem:[#allocation15_spill]]  ;;  %s2686_s21 = scalar_lea.vmem %s2652_s4, %s2383_s15 }
  0x25   : > { %v702_v2 = vsel %vm701_vm1, %v2449_v1, 0.0  ;;  %v2184_v8 = vld [vmem:[%s2400_s29] sm:$0xff]   ;;  %2029 = vmatprep.subr.bf16.mxu1 %v2271_v9  ;;  %2033 = vmatprep.mubr.msk.bf16.mxu1 %vm2272_vm2, %v2271_v9  ;;  %s2683_s29 = scalar_lea.vmem %s2649_s1, %s2383_s15  ;;  %vm798_vm3 = vcmask 257024   ;;  %s2273_s14 = smov 64   ;;  %vm817_vm4 = vcmask 64512   ;;  %vm882_vm5 = vcmask 1043456  }
  0x26   : > { %703 = vadd.xlane.f32.xlu0 %v702_v2  ;;  %2030 = vmatpush3.bf16.msra.mxu1 %v2184_v8  ;;  %v1941_v15 = vld [vmem:[%s2683_s29] ss:$0 sm:$0xff]  ;;  %s2274_s24 = smov 96   ;;  %s2275_s27 = smov 120  }
  0x27   : > { %2055 = vmatprep.subr.bf16.mxu0 %v2271_v9  ;;  %2031 = vmatprep.subr.bf16.mxu1 %v2271_v9  ;;  %v1943_v21 = vld [vmem:[%s2686_s21] ss:$0 sm:$0xff]  ;;  %s2276_s28 = smov 112   ;;  %s2277_s30 = smov 104  }
  0x28   : > { %2057 = vmatprep.mubr.msk.bf16.mxu0 %vm2272_vm2, %v2271_v9  ;;  %s2687_s5 = scalar_lea.vmem %s2654_s6, %s2383_s15  ;;  %s2688_s19 = scalar_lea.vmem %s2655_s7, %s2383_s15 }
  0x29   : > { %s2690_s21 = sld [smem:[#allocation8_spill]] }
  0x2a   : > { %2032 = vmatpush3.bf16.msra.mxu1 %v2185_v10  ;;  %s2685_s17 = scalar_lea.vmem %s2684_s25, %s2383_s15 }
  0x2b   : > { %2037 = vmatprep.subr.bf16.mxu1 %v2271_v9  ;;  %v1942_v17 = vld [vmem:[%s2685_s17] ss:$0 sm:$0xff] }
  0x2f   : > { %p1716_p8 = scmp.eq.s32.totalorder %s2690_s21, 1 }
  0xb3   : > { %v704_v3 = vpop.xlane.xlu0 %703 }
  0xb4   : > { %v706_v4 = vmul.f32 0.03125, %v704_v3 }
  0xb6   : > { %v707_v5 = vsub.f32 %v2449_v1, %v706_v4 }
  0xb8   : > { %v708_v6 = vmul.f32 %v707_v5, %v707_v5 }
  0xba   : > { %v709_v7 = vsel %vm701_vm1, %v708_v6, 0.0 }
  0xbb   : > { %710 = vadd.xlane.f32.xlu0 %v709_v7 }
 0x148   : > { %v711_v11 = vpop.xlane.xlu0 %710 }
 0x149   : > { %v712_v12 = vmul.f32 0.03125, %v711_v11 }
 0x14b   : > { %v713_v13 = vadd.f32 1e-05, %v712_v12  ;;  %v930_v12 = vld [vmem:[%s2409_s0] sm:$0xf] }
 0x14d   : > { %2199 = vrsqrt.f32 %v713_v13  ;;  %v1108_v13 = vsel %vm882_vm5, %v930_v12, 0 }
 0x157   : > { %v2200_v14 = vpop.eup %2199 }
 0x158   : > { %v715_v16 = vmul.f32 %v2200_v14, %v707_v5  ;;  %v1057_v14 = vld [vmem:[%s2409_s0 + $0x4] sm:$0xf] }
 0x15a   : > { %v722_v18 = vmul.f32 %v1941_v15, %v715_v16  ;;  %v1062_v15 = vsel %vm882_vm5, %v1057_v14, 0 }
 0x15c   : > { %v729_v19 = vadd.f32 %v1942_v17, %v722_v18 }
 0x15e   : > { %v730_v20 = vpack.c.bf16 %v729_v19, %v729_v19 }
 0x160   : > { %2034 = vmatmul.mubr.msk.bf16.vlgmr.msra.gmra.mrb[0].mxu1 %vm701_vm1, %v730_v20 }
 0x161   : > { %2039 = vmatprep.mubr.msk.bf16.mxu1 %vm2272_vm2, %v2271_v9 }
 0x233   : > { %v791_v22 = vpop.f32.mrb[0].mxu1 }
 0x234   : > { %v792_v23 = vadd.f32 %v1943_v21, %v791_v22  ;;  %v2035_v24 = vpop.f32.mrb[1].mxu1 }
 0x235   : > { %v794_v25 = vpop.f32.mrb[2].mxu1 }
 0x236   : > { %v797_v26 = vpack.c.bf16 %v792_v23, %v792_v23  ;;  %v2036_v27 = vpop.f32.mrb[3].mxu1 }
 0x238   : > { %807 = vrot.lane.b32.xlu0 %v797_v26, %s2273_s14  ;;  %803 = vrot.lane.b32.xlu1 %v797_v26, %s2274_s24  ;;  %799 = vst.msk [vmem:[#allocation5] sm:$0xf] %vm798_vm3, %v797_v26 }
 0x23f   : > { %v814_v33 = vld [vmem:[#allocation5] sm:$0xf] }
 0x240   : > { %v2491_v34 = vcombine.low %v814_v33, %v814_v33 }
 0x2aa   : > { %v808_v28 = vpop.permute.xlu0 %807  ;;  %v804_v29 = vpop.permute.xlu1 %803 }
 0x2ab   : > { %810 = vst.msk [vmem:[#allocation7] sm:$0xf] %vm798_vm3, %v808_v28  ;;  %806 = vst.msk [vmem:[#allocation6] sm:$0xf] %vm798_vm3, %v804_v29 }
 0x2b2   : > { %v815_v30 = vld [vmem:[#allocation6] sm:$0xf]  ;;  %v816_v35 = vld [vmem:[#allocation7] sm:$0xf] }
 0x2b3   : > { %v822_v31 = vsel %vm817_vm4, %v815_v30, 0  ;;  %v2487_v32 = vcombine.low %v815_v30, %v815_v30  ;;  %v884_v36 = vsel %vm882_vm5, %v816_v35, 0  ;;  %v2500_v42 = vcombine.low %v816_v35, %v816_v35 }
 0x2b4   : > { %2038 = vmatpush3.bf16.xpose.msra.mxu1 %v822_v31 }
 0x2b5   : > { %939 = vrot.lane.b32.xlu0 %v2487_v32, %s2275_s27  ;;  %2043 = vmatprep.subr.bf16.mxu1 %v2271_v9 }
 0x2b9   : > { %934 = vrot.lane.b32.xlu0 %v2491_v34, %s2275_s27 }
 0x2bb   : > { %2040 = vmatmul.mubr.msk.bf16.vlgmr.msra.gmra.mrb[4].mxu1 %vm817_vm4, %v814_v33 }
 0x2bc   : > { %2044 = vmatpush3.bf16.msra.mxu1 %v884_v36  ;;  %2045 = vmatprep.mubr.msk.bf16.mxu1 %vm2272_vm2, %v2271_v9 }
 0x2bd   : > { %2049 = vmatprep.subr.bf16.mxu1 %v2271_v9 }
 0x327   : > { %v940_v49 = vpop.permute.xlu0 %939 }
 0x328   : > { %v945_v51 = vsel %vm817_vm4, %v940_v49, 0 }
 0x32b   : > { %v935_v52 = vpop.permute.xlu0 %934 }
 0x38e   : > { %v858_v37 = vpop.f32.mrb[4].mxu1 }
 0x38f   : > { %v2041_v38 = vpop.f32.mrb[5].mxu1  ;;  %v864_v39 = vsel %vm817_vm4, %v858_v37, -inf }
 0x390   : > { %865 = vmax.xlane.f32.xlu1 %v864_v39  ;;  %v861_v40 = vpop.f32.mrb[6].mxu1 }
 0x391   : > { %v2042_v41 = vpop.f32.mrb[7].mxu1 }
 0x3a1   : > { %1005 = vrot.lane.b32.xlu1 %v2500_v42, %s2275_s27 }
 0x41d   : > { %v866_v43 = vpop.xlane.xlu1 %865 }
 0x41e   : > { %v870_v44 = vsub.f32 %v858_v37, %v866_v43  ;;  %v867_v53 = vsub.f32 -inf, %v866_v43 }
 0x420   : > { %v871_v45 = vmul.f32 1.442695, %v870_v44  ;;  %v868_v54 = vmul.f32 1.442695, %v867_v53 }
 0x421   : > { %v1006_v46 = vpop.permute.xlu1 %1005 }
 0x422   : > { %v1011_v47 = vsel %vm882_vm5, %v1006_v46, 0  ;;  %2201 = vpow2.f32 %v871_v45 }
 0x423   : > { %2056 = vmatpush3.bf16.msra.mxu0 %v1011_v47  ;;  %2203 = vpow2.f32 %v868_v54 }
 0x424   : > { %2067 = vmatprep.subr.bf16.mxu0 %v2271_v9 }
 0x42c   : > { %v2202_v48 = vpop.eup %2201 }
 0x42d   : > { %v878_v50 = vpack.c.bf16 %v2202_v48, %v2202_v48  ;;  %v2204_v55 = vpop.eup %2203  ;;  %v874_v11 = vsel %vm817_vm4, %v2202_v48, 0.0 }
 0x42e   : > { %v873_v56 = vmul.f32 0.0, %v2204_v55 }
 0x42f   : > { %2046 = vmatmul.mubr.msk.bf16.vlgmr.msra.gmra.mrb[8].mxu1 %vm817_vm4, %v878_v50 }
 0x430   : > { %2050 = vmatpush3.bf16.xpose.msra.mxu1 %v945_v51  ;;  %2051 = vmatprep.mubr.msk.bf16.mxu1 %vm2272_vm2, %v2271_v9 }
 0x431   : > { %2061 = vmatprep.subr.bf16.mxu1 %v2271_v9 }
 0x437   : > { %2052 = vmatmul.mubr.msk.bf16.vlgmr.msra.gmra.mrb[12].mxu1 %vm817_vm4, %v935_v52 }
 0x438   : > { %2063 = vmatprep.mubr.msk.bf16.mxu1 %vm2272_vm2, %v2271_v9  ;;  %2062 = vmatpush3.bf16.msra.mxu1 %v1062_v15 }
 0x439   : > { %2073 = vmatprep.subr.bf16.mxu1 %v2271_v9 }
 0x502   : > { %v920_v57 = vpop.f32.mrb[8].mxu1 }
 0x503   : > { %v926_v58 = vadd.f32 %v920_v57, %v873_v56  ;;  %v2047_v59 = vpop.f32.mrb[9].mxu1 }
 0x504   : > { %v923_v60 = vpop.f32.mrb[10].mxu1 }
 0x505   : > { %v2048_v61 = vpop.f32.mrb[11].mxu1 }
 0x50a   : > { %v981_v62 = vpop.f32.mrb[12].mxu1 }
 0x50b   : > { %v2053_v63 = vpop.f32.mrb[13].mxu1  ;;  %v987_v0 = vsel %vm817_vm4, %v981_v62, -inf }
 0x50c   : > { %988 = vmax.xlane.f32.xlu0 %v987_v0  ;;  %v984_v2 = vpop.f32.mrb[14].mxu1  ;;  %v1267_v0 = vld [vmem:[%s2409_s0 + $0x8] sm:$0xf] }
 0x50d   : > { %v2054_v3 = vpop.f32.mrb[15].mxu1  ;;  %v1272_v2 = vsel %vm882_vm5, %v1267_v0, 0 }
 0x522   : > { %1152 = vrot.lane.b32.xlu0 %v2487_v32, %s2276_s28 }
 0x526   : > { %1150 = vrot.lane.b32.xlu0 %v2491_v34, %s2276_s28 }
 0x599   : > { %v989_v4 = vpop.xlane.xlu0 %988 }
 0x59a   : > { %v993_v5 = vsub.f32 %v981_v62, %v989_v4  ;;  %v990_v24 = vsub.f32 -inf, %v989_v4 }
 0x59c   : > { %v994_v6 = vmul.f32 1.442695, %v993_v5  ;;  %v991_v25 = vmul.f32 1.442695, %v990_v24 }
 0x59d   : > { %v1153_v36 = vpop.permute.xlu0 %1152 }
 0x59e   : > { %2205 = vpow2.f32 %v994_v6  ;;  %v1158_v38 = vsel %vm817_vm4, %v1153_v36, 0 }
 0x5a1   : > { %v1151_v39 = vpop.permute.xlu0 %1150 }
 0x5a8   : > { %v2206_v7 = vpop.eup %2205 }
 0x5a9   : > { %v997_v8 = vsel %vm817_vm4, %v2206_v7, 0.0  ;;  %v1001_v10 = vpack.c.bf16 %v2206_v7, %v2206_v7 }
 0x5aa   : > { %998 = vadd.xlane.f32.xlu1 %v997_v8 }
 0x5ab   : > { %2058 = vmatmul.mubr.msk.bf16.vlgmr.msra.gmra.mrb[0].mxu0 %vm817_vm4, %v1001_v10 }
 0x5ac   : > { %2069 = vmatprep.mubr.msk.bf16.mxu0 %vm2272_vm2, %v2271_v9  ;;  %2068 = vmatpush3.bf16.msra.mxu0 %v1108_v13 }
 0x5ad   : > { %2079 = vmatprep.subr.bf16.mxu0 %v2271_v9 }
 0x5ae   : > { %875 = vadd.xlane.f32.xlu1 %v874_v11 }
 0x5bf   : > { %1215 = vrot.lane.b32.xlu1 %v2500_v42, %s2276_s28 }
 0x5c3   : > { %1317 = vrot.lane.b32.xlu1 %v2487_v32, %s2277_s30 }
 0x5c7   : > { %1315 = vrot.lane.b32.xlu1 %v2491_v34, %s2277_s30 }
 0x637   : > { %v999_v16 = vpop.xlane.xlu1 %998 }
 0x63b   : > { %v876_v17 = vpop.xlane.xlu1 %875 }
 0x63c   : > { %v877_v18 = vadd.f32 %v876_v17, %v873_v56 }
 0x63e   : > { %2207 = vrcp.f32 %v877_v18 }
 0x63f   : > { %v1216_v21 = vpop.permute.xlu1 %1215  ;;  %2209 = vpow2.f32 %v991_v25 }
 0x640   : > { %v1221_v23 = vsel %vm882_vm5, %v1216_v21, 0 }
 0x643   : > { %v1318_v59 = vpop.permute.xlu1 %1317 }
 0x644   : > { %v1323_v62 = vsel %vm817_vm4, %v1318_v59, 0 }
 0x647   : > { %v1316_v63 = vpop.permute.xlu1 %1315 }
 0x648   : > { %v2208_v19 = vpop.eup %2207 }
 0x649   : > { %v928_v20 = vmul.f32 %v2208_v19, %v926_v58  ;;  %v2210_v26 = vpop.eup %2209 }
 0x64a   : > { %v996_v27 = vmul.f32 0.0, %v2210_v26 }
 0x64b   : > { %v929_v22 = vpack.c.bf16 %v928_v20, %v928_v20 }
 0x64c   : > { %v1000_v28 = vadd.f32 %v999_v16, %v996_v27 }
 0x64d   : > { %2070 = vmatmul.mubr.msk.bf16.vlgmr.msra.gmra.mrb[4].mxu0 %vm817_vm4, %v929_v22 }
 0x64e   : > { %2080 = vmatpush3.bf16.msra.mxu0 %v1221_v23  ;;  %2081 = vmatprep.mubr.msk.bf16.mxu0 %vm2272_vm2, %v2271_v9  ;;  %2211 = vrcp.f32 %v1000_v28 }
 0x64f   : > { %2091 = vmatprep.subr.bf16.mxu0 %v2271_v9 }
 0x658   : > { %v2212_v32 = vpop.eup %2211 }
 0x67e   : > { %v1047_v29 = vpop.f32.mrb[0].mxu0 }
 0x67f   : > { %v1053_v30 = vadd.f32 %v1047_v29, %v996_v27  ;;  %v2059_v31 = vpop.f32.mrb[1].mxu0 }
 0x680   : > { %v1050_v33 = vpop.f32.mrb[2].mxu0 }
 0x681   : > { %v1055_v34 = vmul.f32 %v2212_v32, %v1053_v30  ;;  %v2060_v35 = vpop.f32.mrb[3].mxu0 }
 0x682   : > { %v1432_v35 = vld [vmem:[%s2409_s0 + $0xc] sm:$0xf] }
 0x683   : > { %v1056_v37 = vpack.c.bf16 %v1055_v34, %v1055_v34  ;;  %v1437_v36 = vsel %vm882_vm5, %v1432_v35, 0 }
 0x685   : > { %2064 = vmatmul.mubr.msk.bf16.vlgmr.msra.gmra.mrb[16].mxu1 %vm817_vm4, %v1056_v37 }
 0x686   : > { %2074 = vmatpush3.bf16.xpose.msra.mxu1 %v1158_v38  ;;  %2075 = vmatprep.mubr.msk.bf16.mxu1 %vm2272_vm2, %v2271_v9 }
 0x687   : > { %2085 = vmatprep.subr.bf16.mxu1 %v2271_v9 }
 0x68d   : > { %2076 = vmatmul.mubr.msk.bf16.vlgmr.msra.gmra.mrb[20].mxu1 %vm817_vm4, %v1151_v39 }
 0x68e   : > { %2087 = vmatprep.mubr.msk.bf16.mxu1 %vm2272_vm2, %v2271_v9  ;;  %2086 = vmatpush3.bf16.msra.mxu1 %v1272_v2 }
 0x68f   : > { %2097 = vmatprep.subr.bf16.mxu1 %v2271_v9 }
 0x720   : > { %v1144_v40 = vpop.f32.mrb[4].mxu0 }
 0x721   : > { %v2071_v41 = vpop.f32.mrb[5].mxu0 }
 0x722   : > { %v1147_v43 = vpop.f32.mrb[6].mxu0 }
 0x723   : > { %v2072_v44 = vpop.f32.mrb[7].mxu0 }
 0x758   : > { %v1098_v45 = vpop.f32.mrb[16].mxu1 }
 0x759   : > { %v2545_v46 = vadd.f32 %v1144_v40, %v1098_v45  ;;  %v2065_v47 = vpop.f32.mrb[17].mxu1 }
 0x75a   : > { %v1101_v48 = vpop.f32.mrb[18].mxu1 }
 0x75b   : > { %v2066_v49 = vpop.f32.mrb[19].mxu1 }
 0x760   : > { %v1194_v50 = vpop.f32.mrb[20].mxu1 }
 0x761   : > { %v2077_v51 = vpop.f32.mrb[21].mxu1  ;;  %v1200_v52 = vsel %vm817_vm4, %v1194_v50, -inf }
 0x762   : > { %1201 = vmax.xlane.f32.xlu0 %v1200_v52  ;;  %v1197_v53 = vpop.f32.mrb[22].mxu1  ;;  %v1963_v52 = vld [vmem:[%s2687_s5] ss:$0 sm:$0xff] }
 0x763   : > { %v2078_v54 = vpop.f32.mrb[23].mxu1 }
 0x7ef   : > { %v1202_v55 = vpop.xlane.xlu0 %1201 }
 0x7f0   : > { %v1206_v56 = vsub.f32 %v1194_v50, %v1202_v55  ;;  %v1203_v3 = vsub.f32 -inf, %v1202_v55 }
 0x7f2   : > { %v1207_v57 = vmul.f32 1.442695, %v1206_v56  ;;  %v1204_v4 = vmul.f32 1.442695, %v1203_v3  ;;  %v2189_v3 = vld [vmem:[%s2426_s26] sm:$0xff]  }
 0x7f4   : > { %2213 = vpow2.f32 %v1207_v57 }
 0x7f5   : > { %2215 = vpow2.f32 %v1204_v4  ;;  %v2190_v4 = vld [vmem:[%s2426_s26 + $0x8] sm:$0xff]   ;;  %s2689_s26 = scalar_lea.vmem %s2656_s8, %s2383_s15 }
 0x7fe   : > { %v2214_v58 = vpop.eup %2213 }
 0x7ff   : > { %v1210_v60 = vsel %vm817_vm4, %v2214_v58, 0.0  ;;  %v1214_v61 = vpack.c.bf16 %v2214_v58, %v2214_v58  ;;  %v2216_v5 = vpop.eup %2215 }
 0x800   : > { %1211 = vadd.xlane.f32.xlu1 %v1210_v60  ;;  %v1209_v7 = vmul.f32 0.0, %v2216_v5 }
 0x801   : > { %2082 = vmatmul.mubr.msk.bf16.vlgmr.msra.gmra.mrb[8].mxu0 %vm817_vm4, %v1214_v61 }
 0x802   : > { %2092 = vmatpush3.bf16.xpose.msra.mxu0 %v1323_v62  ;;  %2093 = vmatprep.mubr.msk.bf16.mxu0 %vm2272_vm2, %v2271_v9 }
 0x803   : > { %2103 = vmatprep.subr.bf16.mxu0 %v2271_v9 }
 0x809   : > { %2094 = vmatmul.mubr.msk.bf16.vlgmr.msra.gmra.mrb[12].mxu0 %vm817_vm4, %v1316_v63 }
 0x80a   : > { %2105 = vmatprep.mubr.msk.bf16.mxu0 %vm2272_vm2, %v2271_v9  ;;  %2104 = vmatpush3.bf16.msra.mxu0 %v1437_v36 }
 0x80b   : > { %2117 = vmatprep.subr.bf16.mxu0 %v2271_v9 }
 0x88d   : > { %v1212_v6 = vpop.xlane.xlu1 %1211 }
 0x88e   : > { %v1213_v8 = vadd.f32 %v1212_v6, %v1209_v7 }
 0x890   : > { %2217 = vrcp.f32 %v1213_v8  ;;  %v1964_v8 = vld [vmem:[%s2688_s19] ss:$0 sm:$0xff] }
 0x89a   : > { %v2218_v13 = vpop.eup %2217 }
 0x8d4   : > { %v1257_v10 = vpop.f32.mrb[8].mxu0 }
 0x8d5   : > { %v1263_v11 = vadd.f32 %v1257_v10, %v1209_v7  ;;  %v2083_v12 = vpop.f32.mrb[9].mxu0 }
 0x8d6   : > { %v1260_v14 = vpop.f32.mrb[10].mxu0 }
 0x8d7   : > { %v1265_v15 = vmul.f32 %v2218_v13, %v1263_v11  ;;  %v2084_v16 = vpop.f32.mrb[11].mxu0  ;;  %v1965_v11 = vld [vmem:[%s2689_s26] ss:$0 sm:$0xff] }
 0x8d8   : > { %v2191_v16 = vld [vmem:[%s2440_s22] sm:$0xff]  }
 0x8d9   : > { %v1266_v17 = vpack.c.bf16 %v1265_v15, %v1265_v15 }
 0x8db   : > { %2088 = vmatmul.mubr.msk.bf16.vlgmr.msra.gmra.mrb[24].mxu1 %vm817_vm4, %v1266_v17  ;;  %v2192_v17 = vld [vmem:[%s2440_s22 + $0x8] sm:$0xff]  }
 0x8dc   : > { %v1359_v18 = vpop.f32.mrb[12].mxu0  ;;  %2099 = vmatprep.mubr.msk.bf16.mxu1 %vm2272_vm2, %v2271_v9 }
 0x8dd   : > { %v2095_v19 = vpop.f32.mrb[13].mxu0  ;;  %v1365_v20 = vsel %vm817_vm4, %v1359_v18, -inf }
 0x8de   : > { %1366 = vmax.xlane.f32.xlu0 %v1365_v20  ;;  %v1362_v21 = vpop.f32.mrb[14].mxu0  ;;  %v2194_v19 = vld [vmem:[%s2440_s22 + $0x18] sm:$0xff]   ;;  %v2195_v20 = vld [vmem:[%s2440_s22 + $0x20] sm:$0xff]  }
 0x8df   : > { %v2096_v22 = vpop.f32.mrb[15].mxu0  ;;  %v2196_v21 = vld [vmem:[%s2440_s22 + $0x28] sm:$0xff]  }
 0x8e0   : > { %v2197_v22 = vld [vmem:[%s2440_s22 + $0x30] sm:$0xff]  }
 0x8f4   : > { %1380 = vrot.lane.b32.xlu0 %v2500_v42, %s2277_s30 }
 0x96b   : > { %v1367_v23 = vpop.xlane.xlu0 %1366 }
 0x96c   : > { %v1371_v24 = vsub.f32 %v1359_v18, %v1367_v23  ;;  %v1368_v37 = vsub.f32 -inf, %v1367_v23  ;;  %v2193_v18 = vld [vmem:[%s2440_s22 + $0x10] sm:$0xff]   ;;  %v2198_v23 = vld [vmem:[%s2440_s22 + $0x38] sm:$0xff]  }
 0x96e   : > { %v1372_v25 = vmul.f32 1.442695, %v1371_v24  ;;  %v1369_v38 = vmul.f32 1.442695, %v1368_v37  ;;  %v1966_v24 = vld [vmem:[%s667_s13] ss:$0 sm:$0xff] }
 0x96f   : > { %v1381_v26 = vpop.permute.xlu0 %1380 }
 0x970   : > { %v1386_v27 = vsel %vm882_vm5, %v1381_v26, 0  ;;  %2219 = vpow2.f32 %v1372_v25 }
 0x971   : > { %2098 = vmatpush3.bf16.msra.mxu1 %v1386_v27  ;;  %2221 = vpow2.f32 %v1369_v38 }
 0x972   : > { %2109 = vmatprep.subr.bf16.mxu1 %v2271_v9 }
 0x97a   : > { %v2220_v28 = vpop.eup %2219 }
 0x97b   : > { %v1375_v29 = vsel %vm817_vm4, %v2220_v28, 0.0  ;;  %v1379_v30 = vpack.c.bf16 %v2220_v28, %v2220_v28  ;;  %v2222_v39 = vpop.eup %2221 }
 0x97c   : > { %1376 = vadd.xlane.f32.xlu0 %v1375_v29  ;;  %v1374_v41 = vmul.f32 0.0, %v2222_v39 }
 0x97d   : > { %2100 = vmatmul.mubr.msk.bf16.vlgmr.msra.gmra.mrb[28].mxu1 %vm817_vm4, %v1379_v30 }
 0x97e   : > { %2113 = vmatprep.mubr.msk.bf16.mxu1 %vm2272_vm2, %v2271_v9  ;;  %2110 = vmatpush3.bf16.msra.mxu1 %v2189_v3 }
 0x97f   : > { %2111 = vmatprep.subr.bf16.mxu1 %v2271_v9 }
 0x982   : > { %2112 = vmatpush3.bf16.msra.mxu1 %v2190_v4 }
 0x9ae   : > { %v1308_v42 = vpop.f32.mrb[24].mxu1 }
 0x9af   : > { %v1314_v31 = vadd.f32 %v1308_v42, %v2545_v46  ;;  %v2089_v32 = vpop.f32.mrb[25].mxu1 }
 0x9b0   : > { %v1311_v33 = vpop.f32.mrb[26].mxu1 }
 0x9b1   : > { %v2090_v34 = vpop.f32.mrb[27].mxu1 }
 0xa09   : > { %v1377_v40 = vpop.xlane.xlu0 %1376 }
 0xa0a   : > { %v1378_v43 = vadd.f32 %v1377_v40, %v1374_v41 }
 0xa0c   : > { %2223 = vrcp.f32 %v1378_v43 }
 0xa16   : > { %v2224_v47 = vpop.eup %2223 }
 0xa50   : > { %v1422_v44 = vpop.f32.mrb[28].mxu1 }
 0xa51   : > { %v1428_v45 = vadd.f32 %v1422_v44, %v1374_v41  ;;  %v2101_v46 = vpop.f32.mrb[29].mxu1  ;;  %v1979_v41 = vld [vmem:[%s680_s23] ss:$0 sm:$0xff] }
 0xa52   : > { %v1425_v48 = vpop.f32.mrb[30].mxu1 }
 0xa53   : > { %v1430_v49 = vmul.f32 %v2224_v47, %v1428_v45  ;;  %v2102_v50 = vpop.f32.mrb[31].mxu1 }
 0xa55   : > { %v1431_v51 = vpack.c.bf16 %v1430_v49, %v1430_v49 }
 0xa57   : > { %2106 = vmatmul.mubr.msk.bf16.vlgmr.msra.gmra.mrb[16].mxu0 %vm817_vm4, %v1431_v51 }
 0xa58   : > { %2133 = vmatprep.mubr.msk.bf16.mxu0 %vm2272_vm2, %v2271_v9  ;;  %2118 = vmatpush3.bf16.msra.mxu0 %v2191_v16 }
 0xa59   : > { %2119 = vmatprep.subr.bf16.mxu0 %v2271_v9 }
 0xa5c   : > { %2120 = vmatpush3.bf16.msra.mxu0 %v2192_v17 }
 0xa5d   : > { %2121 = vmatprep.subr.bf16.mxu0 %v2271_v9 }
 0xa60   : > { %2122 = vmatpush3.bf16.msra.mxu0 %v2193_v18 }
 0xa61   : > { %2123 = vmatprep.subr.bf16.mxu0 %v2271_v9 }
 0xa64   : > { %2124 = vmatpush3.bf16.msra.mxu0 %v2194_v19 }
 0xa65   : > { %2125 = vmatprep.subr.bf16.mxu0 %v2271_v9 }
 0xa68   : > { %2126 = vmatpush3.bf16.msra.mxu0 %v2195_v20 }
 0xa69   : > { %2127 = vmatprep.subr.bf16.mxu0 %v2271_v9 }
 0xa6c   : > { %2128 = vmatpush3.bf16.msra.mxu0 %v2196_v21 }
 0xa6d   : > { %2129 = vmatprep.subr.bf16.mxu0 %v2271_v9 }
 0xa70   : > { %2130 = vmatpush3.bf16.msra.mxu0 %v2197_v22 }
 0xa71   : > { %2131 = vmatprep.subr.bf16.mxu0 %v2271_v9 }
 0xa74   : > { %2132 = vmatpush3.bf16.msra.mxu0 %v2198_v23 }
 0xb2a   : > { %v1473_v53 = vpop.f32.mrb[16].mxu0 }
 0xb2b   : > { %v1479_v54 = vadd.f32 %v1473_v53, %v1314_v31  ;;  %v2107_v55 = vpop.f32.mrb[17].mxu0 }
 0xb2c   : > { %v1476_v56 = vpop.f32.mrb[18].mxu0 }
 0xb2d   : > { %v1486_v57 = vadd.f32 %v1963_v52, %v1479_v54  ;;  %v2108_v58 = vpop.f32.mrb[19].mxu0 }
 0xb2f   : > { %v1488_v59 = vadd.f32 %v1486_v57, %v2449_v1 }
 0xb31   : > { %1489 = vst.msk [vmem:[#allocation3] sm:$0xff] %vm701_vm1, %v1488_v59  ;;  %v1490_v60 = vsel %vm701_vm1, %v1488_v59, 0.0 }
 0xb32   : > { %1491 = vadd.xlane.f32.xlu1 %v1490_v60 }
 0xb38   : > { %v1595_v35 = vld [vmem:[#allocation3] sm:$0xff] }
 0xbbf   : > { %v1492_v61 = vpop.xlane.xlu1 %1491 }
 0xbc0   : > { %v1493_v62 = vmul.f32 0.03125, %v1492_v61 }
 0xbc2   : > { %v1494_v63 = vsub.f32 %v1488_v59, %v1493_v62 }
 0xbc4   : > { %v1495_v0 = vmul.f32 %v1494_v63, %v1494_v63 }
 0xbc6   : > { %v1496_v2 = vsel %vm701_vm1, %v1495_v0, 0.0 }
 0xbc7   : > { %1497 = vadd.xlane.f32.xlu1 %v1496_v2 }
 0xc54   : > { %v1498_v1 = vpop.xlane.xlu1 %1497 }
 0xc55   : > { %v1499_v5 = vmul.f32 0.03125, %v1498_v1 }
 0xc57   : > { %v1500_v6 = vadd.f32 1e-05, %v1499_v5 }
 0xc59   : > { %2225 = vrsqrt.f32 %v1500_v6 }
 0xc63   : > { %v2226_v7 = vpop.eup %2225 }
 0xc64   : > { %v1502_v10 = vmul.f32 %v2226_v7, %v1494_v63 }
 0xc66   : > { %v1509_v12 = vmul.f32 %v1964_v8, %v1502_v10 }
 0xc68   : > { %v1516_v13 = vadd.f32 %v1965_v11, %v1509_v12 }
 0xc6a   : > { %v1517_v14 = vpack.c.bf16 %v1516_v13, %v1516_v13 }
 0xc6c   : > { %1518 = vst.msk [vmem:[#allocation4] sm:$0xf] %vm798_vm3, %v1517_v14 }
 0xc73   : > { %v1519_v15 = vld [vmem:[#allocation4] sm:$0xf] }
 0xc74   : > { %2114 = vmatmul.mubr.msk.bf16.vlgmr.msra.gmra.mrb[32].mxu1 %vm701_vm1, %v1519_v15 }
 0xd47   : > { %v1581_v25 = vpop.f32.mrb[32].mxu1 }
 0xd48   : > { %v1582_v26 = vadd.f32 %v1966_v24, %v1581_v25  ;;  %v2115_v27 = vpop.f32.mrb[33].mxu1 }
 0xd49   : > { %v1584_v28 = vpop.f32.mrb[34].mxu1 }
 0xd4a   : > { %v1970_v29 = vmul.f32 -1.702, %v1582_v26  ;;  %v2116_v30 = vpop.f32.mrb[35].mxu1 }
 0xd4c   : > { %v1589_v42 = vmul.f32 1.442695, %v1970_v29 }
 0xd4e   : > { %2227 = vpow2.f32 %v1589_v42 }
 0xd58   : > { %v2228_v31 = vpop.eup %2227 }
 0xd59   : > { %v1591_v32 = vadd.f32 1.0, %v2228_v31 }
 0xd5b   : > { %2229 = vrcp.f32 %v1591_v32 }
 0xd65   : > { %v2230_v9 = vpop.eup %2229 }
 0xd66   : > { %v1594_v33 = vmul.f32 %v2230_v9, %v1582_v26 }
 0xd68   : > { %v1596_v34 = vpack.c.bf16 %v1594_v33, %v1594_v33 }
 0xd6a   : > { %2134 = vmatmul.mubr.bf16.vlgmr.msra.gmra.mrb[20].mxu0 %v1596_v34 }
 0xe3d   : > { %v1695_v36 = vpop.f32.mrb[20].mxu0 }
 0xe3e   : > { %v1701_v37 = vadd.f32 %v1695_v36, %v1595_v35  ;;  %v2135_v38 = vpop.f32.mrb[21].mxu0 }
 0xe3f   : > { %v1698_v39 = vpop.f32.mrb[22].mxu0 }
 0xe40   : > { %1702 = vst.msk [vmem:[#allocation3] sm:$0xff] %vm701_vm1, %v1701_v37  ;;  %v2136_v40 = vpop.f32.mrb[23].mxu0 }
 0xe44   : > { %1720 = sbr.rel (!%p1716_p8) target bundleno = 3667 (0xe53), region = 88 }
 0xe47   : > { %v1706_v43 = vld [vmem:[#allocation3] sm:$0xff] }
 0xe48   : > { %v1714_v44 = vadd.f32 %v1979_v41, %v1706_v43 }
 0xe4a   : > { %1715 = vst.msk [vmem:[#allocation2] sm:$0xff] %vm701_vm1, %v1714_v44 }
 0xe51   : > { %v1721_v45 = vld [vmem:[#allocation2] sm:$0xff] }
 0xe52   : > { %1722 = vst.msk [vmem:[%s2445_s2] sm:$0xff] %vm701_vm1, %v1721_v45 }
 0xe53 PF: > { %s2691_s14 = sld [smem:[#allocation11_spill]]  ;;  %s2692_s25 = sld [smem:[#allocation9_spill]] }
 0xe54   : > { %s2693_s26 = sld [smem:[#allocation10_spill]]  ;;  %s2694_s27 = sld [smem:[#allocation12_spill]] }
 0xe55   : > { %s2695_s28 = sld [smem:[#allocation13_spill]] }
 0xe59   : > { %s23_s29 = sadd.s32 1, %s2691_s14  }
 0xe5a   : > { %p20_p9 = scmp.ge.s32.totalorder %s23_s29, 6  }
 0xe5c   :  { %22 = sbr.rel (!%p20_p9) target bundleno = 6 (0x6), region = 154 }

</bundles_post_ra>
